<compile_context>
chip_gen: v5e
topology: v5e:2x2
jax: 0.10.0
libtpu: 0.0.40
codegen_flags: <defaults>
</compile_context>

<pallas_src>
import jax
import jax.numpy as jnp
from jax.experimental import pallas as pl
from jax.experimental.pallas import tpu as pltpu

IN_DIM = 76
H_DIM = 220
H3_DIM = 200
OUT_DIM = 1

PAD_IN = 128   # 76  -> 128
PAD_H = 256    # 220 -> 256, 200 -> 256


def _disc_kernel(x_ref,
                 w1_ref, b1_ref,
                 w2_ref, b2_ref,
                 w3_ref, b3_ref,
                 w4t_ref, b4_ref,
                 o_ref):
    cdt = w1_ref.dtype                                    # matmul input dtype
    x = x_ref[...]                                        # (tm, 128)
    h = jnp.dot(x, w1_ref[...], preferred_element_type=jnp.float32)
    h = jnp.maximum(h + b1_ref[...], 0.0)                 # (tm, 256) f32
    h = jnp.dot(h.astype(cdt), w2_ref[...], preferred_element_type=jnp.float32)
    h = jnp.maximum(h + b2_ref[...], 0.0)                 # (tm, 256) f32
    h = jnp.dot(h.astype(cdt), w3_ref[...], preferred_element_type=jnp.float32)
    h = jnp.maximum(h + b3_ref[...], 0.0)                 # (tm, 256) f32
    # Final layer has a single output unit; compute it as
    #   (1, K) @ (tm, K)^T -> (1, tm)
    # so the result (and the output store) is lane-dense instead of a (tm, 1)
    # column that would lower to masked single-lane stores.
    logits = jax.lax.dot_general(
        w4t_ref[...], h.astype(cdt),
        dimension_numbers=(((1,), (1,)), ((), ())),
        preferred_element_type=jnp.float32)               # (1, tm)
    o_ref[...] = jax.nn.sigmoid(logits + b4_ref[0, 0])


def _pad2(a, rows, cols, dtype):
    out = jnp.zeros((rows, cols), dtype)
    return out.at[:a.shape[0], :a.shape[1]].set(a.astype(dtype))


def prepare_params(params, compute_dtype=jnp.bfloat16):
    """Pad weights to hardware-aligned shapes and cast matmul operands.

    compute_dtype=jnp.bfloat16 uses the native bf16 MXU path on v5e/v6e/v7x
    (accumulation stays f32). Pass jnp.float32 for exact-f32 matmuls.
    """
    w1, b1, w2, b2, w3, b3, w4, b4 = params
    w1p = _pad2(w1, PAD_IN, PAD_H, compute_dtype)         # (128, 256)
    w2p = _pad2(w2, PAD_H, PAD_H, compute_dtype)          # (256, 256)
    w3p = _pad2(w3, PAD_H, PAD_H, compute_dtype)          # (256, 256)
    w4tp = _pad2(w4.T, 1, PAD_H, compute_dtype)           # (1, 256) transposed
    b1p = _pad2(b1, 1, PAD_H, jnp.float32)
    b2p = _pad2(b2, 1, PAD_H, jnp.float32)
    b3p = _pad2(b3, 1, PAD_H, jnp.float32)
    b4s = b4.reshape(1, 1).astype(jnp.float32)            # scalar, lives in SMEM
    return (w1p, b1p, w2p, b2p, w3p, b3p, w4tp, b4s)


def _choose_tm(B):
    # tm must be a multiple of 128 (lane-dense output rows, full MXU tiles).
    # Prefer big tiles, but keep >=2 grid steps when the batch allows so the
    # "parallel" grid axis can shard across v7x's two TensorCores.
    for cand in (512, 256, 128):
        if B >= 2 * cand:
            return cand
    return 128


def discriminator_forward(x, prepared_params, *, tm=None):
    """x: (B, 76) float. Returns (B,) float32 (matches PyTorch .view(-1))."""
    (w1p, b1p, w2p, b2p, w3p, b3p, w4tp, b4s) = prepared_params
    cdt = w1p.dtype
    B = x.shape[0]
    if tm is None:
        tm = _choose_tm(B)
    n_tiles = pl.cdiv(B, tm)
    B_pad = n_tiles * tm

    # Pad batch to a tile multiple and features 76 -> 128. Zero padding is
    # inert because the padded weight rows/cols are zero as well.
    xp = jnp.zeros((B_pad, PAD_IN), cdt).at[:B, :IN_DIM].set(x.astype(cdt))

    full = lambda arr: pl.BlockSpec(arr.shape, lambda i: (0,) * arr.ndim)

    flops = 2 * B_pad * (IN_DIM * H_DIM + H_DIM * H_DIM
                         + H_DIM * H3_DIM + H3_DIM * OUT_DIM)
    param_bytes = sum(int(p.size) * p.dtype.itemsize for p in prepared_params)
    bytes_accessed = int(xp.size) * xp.dtype.itemsize + param_bytes + B_pad * 4

    out = pl.pallas_call(
        _disc_kernel,
        out_shape=jax.ShapeDtypeStruct((n_tiles, tm), jnp.float32),
        grid_spec=pltpu.PrefetchScalarGridSpec(
            num_scalar_prefetch=0,
            grid=(n_tiles,),
            in_specs=[
                pl.BlockSpec((tm, PAD_IN), lambda i: (i, 0)),   # x batch tile
                full(w1p), full(b1p),
                full(w2p), full(b2p),
                full(w3p), full(b3p),
                full(w4tp),
                pl.BlockSpec(memory_space=pltpu.MemorySpace.SMEM),  # scalar b4
            ],
            out_specs=pl.BlockSpec((1, tm), lambda i: (i, 0)),  # lane-dense row
        ),
        compiler_params=pltpu.CompilerParams(
            dimension_semantics=("parallel",)),
        cost_estimate=pl.CostEstimate(
            flops=flops,
            transcendentals=B_pad,
            bytes_accessed=bytes_accessed),
    )(xp, w1p, b1p, w2p, b2p, w3p, b3p, w4tp, b4s)

    return out.reshape(-1)[:B]


def init_params(key):
    """Deterministic synthetic parameters. Weights stored as (in, out) so the
    kernel computes x @ W + b (== PyTorch x @ W_pt.T + b); biases as (1, out)."""
    ks = jax.random.split(key, 8)

    def lin(kw, kb, fan_in, fan_out):
        bound = 1.0 / jnp.sqrt(fan_in)
        w = jax.random.uniform(kw, (fan_in, fan_out), jnp.float32, -bound, bound)
        b = jax.random.uniform(kb, (1, fan_out), jnp.float32, -bound, bound)
        return w, b

    w1, b1 = lin(ks[0], ks[1], IN_DIM, H_DIM)
    w2, b2 = lin(ks[2], ks[3], H_DIM, H_DIM)
    w3, b3 = lin(ks[4], ks[5], H_DIM, H3_DIM)
    w4, b4 = lin(ks[6], ks[7], H3_DIM, OUT_DIM)
    return (w1, b1, w2, b2, w3, b3, w4, b4)


def _reference(x, params):
    w1, b1, w2, b2, w3, b3, w4, b4 = params
    h = jnp.maximum(x @ w1 + b1, 0.0)
    h = jnp.maximum(h @ w2 + b2, 0.0)
    h = jnp.maximum(h @ w3 + b3, 0.0)
    return jax.nn.sigmoid(h @ w4 + b4).reshape(-1)


if __name__ == "__main__":
    key = jax.random.PRNGKey(0)
    k_param, k_x = jax.random.split(key)

    params = init_params(k_param)
    B = 16
    x = jax.random.normal(k_x, (B, IN_DIM), jnp.float32)

    ref = _reference(x, params)

    # f32 path: matches the pure-JAX reference tightly.
    out_f32 = discriminator_forward(x, prepare_params(params, jnp.float32))
    out_f32 = jax.block_until_ready(out_f32)
    assert out_f32.shape == (B,)
    assert jnp.allclose(out_f32, ref, atol=1e-4, rtol=1e-4)

    # bf16 path (default): bf16 MXU operands, f32 accumulation -> looser tol.
    out_bf16 = discriminator_forward(x, prepare_params(params))
    out_bf16 = jax.block_until_ready(out_bf16)
    assert out_bf16.shape == (B,)
    assert jnp.allclose(out_bf16, ref, atol=2e-2, rtol=2e-2)

    print("KERNEL_OK")
</pallas_src>

<mosaic_0001>
module attributes {stable_mosaic.version = 11 : i64} {
  func.func @_disc_kernel(%arg0: i32, %arg1: memref<128x128xf32, #tpu.memory_space<vmem>>, %arg2: memref<128x256xf32, #tpu.memory_space<vmem>>, %arg3: memref<1x256xf32, #tpu.memory_space<vmem>>, %arg4: memref<256x256xf32, #tpu.memory_space<vmem>>, %arg5: memref<1x256xf32, #tpu.memory_space<vmem>>, %arg6: memref<256x256xf32, #tpu.memory_space<vmem>>, %arg7: memref<1x256xf32, #tpu.memory_space<vmem>>, %arg8: memref<1x256xf32, #tpu.memory_space<vmem>>, %arg9: memref<1x1xf32, #tpu.memory_space<smem>>, %arg10: memref<1x128xf32, #tpu.memory_space<vmem>>) attributes {dimension_semantics = [#tpu.dimension_semantics<parallel>], iteration_bounds = array<i64: 1>, scalar_prefetch = 0 : i64, scratch_operands = 0 : i64, tpu.core_type = #tpu.core_type<tc>, window_params = [{transform_indices = @transform_0, window_bounds = array<i64: 128, 128>}, {pipeline_mode = #tpu.pipeline_mode<synchronous>, transform_indices = @transform_1, window_bounds = array<i64: 128, 256>}, {pipeline_mode = #tpu.pipeline_mode<synchronous>, transform_indices = @transform_2, window_bounds = array<i64: 1, 256>}, {pipeline_mode = #tpu.pipeline_mode<synchronous>, transform_indices = @transform_3, window_bounds = array<i64: 256, 256>}, {pipeline_mode = #tpu.pipeline_mode<synchronous>, transform_indices = @transform_4, window_bounds = array<i64: 1, 256>}, {pipeline_mode = #tpu.pipeline_mode<synchronous>, transform_indices = @transform_5, window_bounds = array<i64: 256, 256>}, {pipeline_mode = #tpu.pipeline_mode<synchronous>, transform_indices = @transform_6, window_bounds = array<i64: 1, 256>}, {pipeline_mode = #tpu.pipeline_mode<synchronous>, transform_indices = @transform_7, window_bounds = array<i64: 1, 256>}, {transform_indices = @transform_8, window_bounds = array<i64: 1, 1>}, {transform_indices = @transform_9, window_bounds = array<i64: 1, 128>}]} {
    %c0 = arith.constant 0 : index
    %c0_0 = arith.constant 0 : index
    %0 = vector.load %arg1[%c0, %c0_0] : memref<128x128xf32, #tpu.memory_space<vmem>>, vector<128x128xf32>
    %c0_1 = arith.constant 0 : index
    %c0_2 = arith.constant 0 : index
    %1 = vector.load %arg2[%c0_1, %c0_2] : memref<128x256xf32, #tpu.memory_space<vmem>>, vector<128x256xf32>
    %cst = arith.constant dense<0.000000e+00> : vector<128x256xf32>
    %2 = tpu.matmul %0, %1, %cst {dimension_numbers = #tpu.dot_dimension_numbers<[1], [0], [0], [1], [0, 0, 1, 1], [], []>} : vector<128x128xf32>, vector<128x256xf32>, vector<128x256xf32> -> vector<128x256xf32>
    %c0_3 = arith.constant 0 : index
    %c0_4 = arith.constant 0 : index
    %3 = vector.load %arg3[%c0_3, %c0_4] : memref<1x256xf32, #tpu.memory_space<vmem>>, vector<1x256xf32>
    %4 = vector.broadcast %3 : vector<1x256xf32> to vector<128x256xf32>
    %5 = arith.addf %2, %4 : vector<128x256xf32>
    %cst_5 = arith.constant 0.000000e+00 : f32
    %6 = vector.broadcast %cst_5 : f32 to vector<128x256xf32>
    %7 = arith.maximumf %5, %6 : vector<128x256xf32>
    %c0_6 = arith.constant 0 : index
    %c0_7 = arith.constant 0 : index
    %8 = vector.load %arg4[%c0_6, %c0_7] : memref<256x256xf32, #tpu.memory_space<vmem>>, vector<256x256xf32>
    %cst_8 = arith.constant dense<0.000000e+00> : vector<128x256xf32>
    %9 = tpu.matmul %7, %8, %cst_8 {dimension_numbers = #tpu.dot_dimension_numbers<[1], [0], [0], [1], [0, 0, 1, 1], [], []>} : vector<128x256xf32>, vector<256x256xf32>, vector<128x256xf32> -> vector<128x256xf32>
    %c0_9 = arith.constant 0 : index
    %c0_10 = arith.constant 0 : index
    %10 = vector.load %arg5[%c0_9, %c0_10] : memref<1x256xf32, #tpu.memory_space<vmem>>, vector<1x256xf32>
    %11 = vector.broadcast %10 : vector<1x256xf32> to vector<128x256xf32>
    %12 = arith.addf %9, %11 : vector<128x256xf32>
    %cst_11 = arith.constant 0.000000e+00 : f32
    %13 = vector.broadcast %cst_11 : f32 to vector<128x256xf32>
    %14 = arith.maximumf %12, %13 : vector<128x256xf32>
    %c0_12 = arith.constant 0 : index
    %c0_13 = arith.constant 0 : index
    %15 = vector.load %arg6[%c0_12, %c0_13] : memref<256x256xf32, #tpu.memory_space<vmem>>, vector<256x256xf32>
    %cst_14 = arith.constant dense<0.000000e+00> : vector<128x256xf32>
    %16 = tpu.matmul %14, %15, %cst_14 {dimension_numbers = #tpu.dot_dimension_numbers<[1], [0], [0], [1], [0, 0, 1, 1], [], []>} : vector<128x256xf32>, vector<256x256xf32>, vector<128x256xf32> -> vector<128x256xf32>
    %c0_15 = arith.constant 0 : index
    %c0_16 = arith.constant 0 : index
    %17 = vector.load %arg7[%c0_15, %c0_16] : memref<1x256xf32, #tpu.memory_space<vmem>>, vector<1x256xf32>
    %18 = vector.broadcast %17 : vector<1x256xf32> to vector<128x256xf32>
    %19 = arith.addf %16, %18 : vector<128x256xf32>
    %cst_17 = arith.constant 0.000000e+00 : f32
    %20 = vector.broadcast %cst_17 : f32 to vector<128x256xf32>
    %21 = arith.maximumf %19, %20 : vector<128x256xf32>
    %c0_18 = arith.constant 0 : index
    %c0_19 = arith.constant 0 : index
    %22 = vector.load %arg8[%c0_18, %c0_19] : memref<1x256xf32, #tpu.memory_space<vmem>>, vector<1x256xf32>
    %cst_20 = arith.constant dense<0.000000e+00> : vector<1x128xf32>
    %23 = tpu.matmul %22, %21, %cst_20 {dimension_numbers = #tpu.dot_dimension_numbers<[1], [1], [0], [0], [0, 0, 1, 0], [], []>} : vector<1x256xf32>, vector<128x256xf32>, vector<1x128xf32> -> vector<1x128xf32>
    %c0_21 = arith.constant 0 : index
    %c0_22 = arith.constant 0 : index
    %24 = memref.load %arg9[%c0_21, %c0_22] : memref<1x1xf32, #tpu.memory_space<smem>>
    %25 = vector.broadcast %24 : f32 to vector<1x128xf32>
    %26 = arith.addf %23, %25 : vector<1x128xf32>
    %27 = arith.negf %26 : vector<1x128xf32>
    %28 = math.exp %27 : vector<1x128xf32>
    %cst_23 = arith.constant 1.000000e+00 : f32
    %29 = vector.broadcast %cst_23 : f32 to vector<1x128xf32>
    %30 = arith.addf %29, %28 : vector<1x128xf32>
    %31 = arith.divf %29, %30 : vector<1x128xf32>
    %c0_24 = arith.constant 0 : index
    %c0_25 = arith.constant 0 : index
    %32 = vector.load %arg10[%c0_24, %c0_25] : memref<1x128xf32, #tpu.memory_space<vmem>>, vector<1x128xf32>
    tpu.vector_store %arg10[%c0_24, %c0_25], %31 {strides = array<i32>} : memref<1x128xf32, #tpu.memory_space<vmem>>, vector<1x128xf32>,
    return
  }
  func.func @transform_0(%arg0: i32) -> (i32, i32) {
    %c0_i32 = arith.constant 0 : i32
    %c0_i32_0 = arith.constant 0 : i32
    return %arg0, %c0_i32 : i32, i32
  }
  func.func @transform_1(%arg0: i32) -> (i32, i32) {
    %c0_i32 = arith.constant 0 : i32
    %c0_i32_0 = arith.constant 0 : i32
    %c0_i32_1 = arith.constant 0 : i32
    return %c0_i32, %c0_i32_0 : i32, i32
  }
  func.func @transform_2(%arg0: i32) -> (i32, i32) {
    %c0_i32 = arith.constant 0 : i32
    %c0_i32_0 = arith.constant 0 : i32
    %c0_i32_1 = arith.constant 0 : i32
    return %c0_i32, %c0_i32_0 : i32, i32
  }
  func.func @transform_3(%arg0: i32) -> (i32, i32) {
    %c0_i32 = arith.constant 0 : i32
    %c0_i32_0 = arith.constant 0 : i32
    %c0_i32_1 = arith.constant 0 : i32
    return %c0_i32, %c0_i32_0 : i32, i32
  }
  func.func @transform_4(%arg0: i32) -> (i32, i32) {
    %c0_i32 = arith.constant 0 : i32
    %c0_i32_0 = arith.constant 0 : i32
    %c0_i32_1 = arith.constant 0 : i32
    return %c0_i32, %c0_i32_0 : i32, i32
  }
  func.func @transform_5(%arg0: i32) -> (i32, i32) {
    %c0_i32 = arith.constant 0 : i32
    %c0_i32_0 = arith.constant 0 : i32
    %c0_i32_1 = arith.constant 0 : i32
    return %c0_i32, %c0_i32_0 : i32, i32
  }
  func.func @transform_6(%arg0: i32) -> (i32, i32) {
    %c0_i32 = arith.constant 0 : i32
    %c0_i32_0 = arith.constant 0 : i32
    %c0_i32_1 = arith.constant 0 : i32
    return %c0_i32, %c0_i32_0 : i32, i32
  }
  func.func @transform_7(%arg0: i32) -> (i32, i32) {
    %c0_i32 = arith.constant 0 : i32
    %c0_i32_0 = arith.constant 0 : i32
    %c0_i32_1 = arith.constant 0 : i32
    return %c0_i32, %c0_i32_0 : i32, i32
  }
  func.func @transform_8(%arg0: i32) -> (i32, i32) {
    %c0_i32 = arith.constant 0 : i32
    %c0_i32_0 = arith.constant 0 : i32
    %c0_i32_1 = arith.constant 0 : i32
    return %c0_i32, %c0_i32_0 : i32, i32
  }
  func.func @transform_9(%arg0: i32) -> (i32, i32) {
    %c0_i32 = arith.constant 0 : i32
    %c0_i32_0 = arith.constant 0 : i32
    return %arg0, %c0_i32 : i32, i32
  }
}

</mosaic_0001>

<bundles_post_ra>
// kernel: tpu_custom_call.1
= control target key start
LH: loop header
LB: loop body
LE: loop exit
PB: predicated region body
PF: predicated region fallthrough
CT: control target
= control target key end

     0   :  { %15 = vsyncpa [#allocation4], 0  ;;  %s1558_s0 = inlined_call_operand.hbm [shape: f32[128,128], index: 0, kind: input, shape index: {}]   ;;  %s1559_s1 = inlined_call_operand.hbm [shape: f32[128,256], index: 1, kind: input, shape index: {}]   ;;  %s1560_s2 = inlined_call_operand.vmem [shape: f32[1,256], index: 2, kind: input, shape index: {}]   ;;  %s1561_s3 = inlined_call_operand.hbm [shape: f32[256,256], index: 3, kind: input, shape index: {}]   ;;  %s1562_s4 = inlined_call_operand.vmem [shape: f32[1,256], index: 4, kind: input, shape index: {}]   ;;  %s1563_s5 = inlined_call_operand.hbm [shape: f32[256,256], index: 5, kind: input, shape index: {}]   ;;  %s1564_s6 = inlined_call_operand.vmem [shape: f32[1,256], index: 6, kind: input, shape index: {}]   ;;  %s1565_s7 = inlined_call_operand.vmem [shape: f32[1,256], index: 7, kind: input, shape index: {}]   ;;  %s1566_s8 = inlined_call_operand.<no memory space> [shape: f32[1,1], index: 8, kind: input, shape index: {}]   ;;  %s1567_s9 = inlined_call_operand.hbm [shape: f32[1,128], index: 9, kind: output, shape index: {}]  }
   0x1   :  { %16 = vsyncpa [#allocation7], 0 }
   0x2   :  { %17 = vsyncpa [#allocation10], 0  ;;  %s36_s11 = sshll.u32 %s1559_s1, 4  ;;  %s37_s11 = int_to_ptr.hbm [resolvable:$true] %s36_s11 }
   0x3   :  { %18 = vsyncpa [#allocation5], 0  ;;  %s1298_s12 = smov [#allocation6]   ;;  %s23_s16 = sshll.u32 %s1558_s0, 4  ;;  %s24_s16 = int_to_ptr.hbm [resolvable:$true] %s23_s16 }
   0x4   :  { %s38_s13 = sshll.u32 %s1298_s12, 4  ;;  %s1299_s17 = smov 256   ;;  %s39_s13 = int_to_ptr.vmem [resolvable:$true] %s38_s13 }
   0x5   :  { %s1300_s18 = smov 16   ;;  %s1301_s19 = smov [#allocation3]  }
   0x6   :  { %44 = dma.hbm_to_vmem [thread:$0]  %s37_s11, 4096, %s39_s13, [#allocation7], %s1299_s17, %s1299_s17, %s1300_s18  }
   0x7   :  { %s25_s20 = sshll.u32 %s1301_s19, 4  ;;  %s1302_s21 = smov 128   ;;  %s26_s20 = int_to_ptr.vmem [resolvable:$true] %s25_s20 }
   0x8   :  { %s1303_s22 = smov 8   ;;  %s51_s24 = sshll.u32 %s1561_s3, 4  ;;  %s52_s24 = int_to_ptr.hbm [resolvable:$true] %s51_s24 }
   0x9   :  { %31 = dma.hbm_to_vmem [thread:$0]  %s24_s16, 2048, %s26_s20, [#allocation4], %s1302_s21, %s1302_s21, %s1303_s22  }
   0xa   :  { %s1304_s25 = smov [#allocation8]   ;;  %s66_s28 = sshll.u32 %s1563_s5, 4  ;;  %s67_s28 = int_to_ptr.hbm [resolvable:$true] %s66_s28 }
   0xb   :  { %s53_s26 = sshll.u32 %s1304_s25, 4  ;;  %s1305_s29 = smov [#allocation9]   ;;  %s54_s26 = int_to_ptr.vmem [resolvable:$true] %s53_s26 }
   0xc   :  { %59 = dma.hbm_to_vmem [thread:$0]  %s52_s24, 8192, %s54_s26, [#allocation7], %s1299_s17, %s1299_s17, %s1300_s18  }
   0xd   :  { %s68_s30 = sshll.u32 %s1305_s29, 4  ;;  %s69_s30 = int_to_ptr.vmem [resolvable:$true] %s68_s30 }
   0xe   :  { %74 = dma.hbm_to_vmem [thread:$0]  %s67_s28, 8192, %s69_s30, [#allocation10], %s1299_s17, %s1299_s17, %s1300_s18  }
   0xf   :  { %1290 = dma.done.wait [#allocation4], 2048  }
  0x10   :  { %1291 = vsyncadd [#allocation4], 4294965248 }
  0x11   :  { %1292 = dma.done.wait [#allocation7], 12288  }
  0x12   :  { %1293 = vsyncadd [#allocation7], 4294955008 }
  0x13   :  { %1294 = dma.done.wait [#allocation10], 8192  }
  0x14   :  { %1295 = vsyncadd [#allocation10], 4294959104  ;;  %v143_v0 = vld [vmem:[#allocation6 + $0xf0] sm:$0xff]  ;;  %v141_v1 = vld [vmem:[#allocation6 + $0xe0] sm:$0xff]  ;;  %s1112_s17 = sshll.u32 %s1567_s9, 4  ;;  %s1113_s17 = int_to_ptr.hbm [resolvable:$true] %s1112_s17 }
  0x15   :  { %v144_v2 = vld [vmem:[#allocation6 + $0xf8] sm:$0xff]  ;;  %151 = vmatpush.msra.mxu0 %v143_v0  ;;  %v142_v3 = vld [vmem:[#allocation6 + $0xe8] sm:$0xff]  ;;  %v139_v4 = vld [vmem:[#allocation6 + $0xd0] sm:$0xff]  ;;  %1125 = vmatpush.msra.mxu2 %v143_v0 }
  0x16   :  { %216 = vmatpush.msra.mxu1 %v144_v2  ;;  %v140_v5 = vld [vmem:[#allocation6 + $0xd8] sm:$0xff]  ;;  %1141 = vmatpush.msra.mxu3 %v144_v2  ;;  %v137_v6 = vld [vmem:[#allocation6 + $0xc0] sm:$0xff]  ;;  %v138_v7 = vld [vmem:[#allocation6 + $0xc8] sm:$0xff] }
  0x17   :  { %152 = vmatpush.msra.mxu0 %v141_v1  ;;  %1126 = vmatpush.msra.mxu2 %v141_v1  ;;  %v135_v8 = vld [vmem:[#allocation6 + $0xb0] sm:$0xff]  ;;  %v136_v9 = vld [vmem:[#allocation6 + $0xb8] sm:$0xff]  ;;  %v133_v10 = vld [vmem:[#allocation6 + $0xa0] sm:$0xff] }
  0x18   :  { %217 = vmatpush.msra.mxu1 %v142_v3  ;;  %1142 = vmatpush.msra.mxu3 %v142_v3  ;;  %v134_v11 = vld [vmem:[#allocation6 + $0xa8] sm:$0xff]  ;;  %v131_v12 = vld [vmem:[#allocation6 + $0x90] sm:$0xff]  ;;  %v132_v13 = vld [vmem:[#allocation6 + $0x98] sm:$0xff] }
  0x19   :  { %153 = vmatpush.msra.mxu0 %v139_v4  ;;  %1127 = vmatpush.msra.mxu2 %v139_v4  ;;  %v129_v14 = vld [vmem:[#allocation6 + $0x80] sm:$0xff]  ;;  %v130_v15 = vld [vmem:[#allocation6 + $0x88] sm:$0xff]  ;;  %v127_v16 = vld [vmem:[#allocation6 + $0x70] sm:$0xff] }
  0x1a   :  { %218 = vmatpush.msra.mxu1 %v140_v5  ;;  %1143 = vmatpush.msra.mxu3 %v140_v5  ;;  %v128_v17 = vld [vmem:[#allocation6 + $0x78] sm:$0xff]  ;;  %v125_v18 = vld [vmem:[#allocation6 + $0x60] sm:$0xff]  ;;  %v126_v19 = vld [vmem:[#allocation6 + $0x68] sm:$0xff] }
  0x1b   :  { %154 = vmatpush.msra.mxu0 %v137_v6  ;;  %1128 = vmatpush.msra.mxu2 %v137_v6  ;;  %v123_v20 = vld [vmem:[#allocation6 + $0x50] sm:$0xff]  ;;  %v124_v21 = vld [vmem:[#allocation6 + $0x58] sm:$0xff]  ;;  %v121_v22 = vld [vmem:[#allocation6 + $0x40] sm:$0xff] }
  0x1c   :  { %219 = vmatpush.msra.mxu1 %v138_v7  ;;  %1144 = vmatpush.msra.mxu3 %v138_v7  ;;  %v122_v23 = vld [vmem:[#allocation6 + $0x48] sm:$0xff]  ;;  %v119_v24 = vld [vmem:[#allocation6 + $0x30] sm:$0xff]  ;;  %v120_v25 = vld [vmem:[#allocation6 + $0x38] sm:$0xff] }
  0x1d   :  { %155 = vmatpush.msra.mxu0 %v135_v8  ;;  %1129 = vmatpush.msra.mxu2 %v135_v8  ;;  %v117_v26 = vld [vmem:[#allocation6 + $0x20] sm:$0xff]  ;;  %v118_v27 = vld [vmem:[#allocation6 + $0x28] sm:$0xff]  ;;  %v115_v28 = vld [vmem:[#allocation6 + $0x10] sm:$0xff] }
  0x1e   :  { %220 = vmatpush.msra.mxu1 %v136_v9  ;;  %1145 = vmatpush.msra.mxu3 %v136_v9  ;;  %v116_v29 = vld [vmem:[#allocation6 + $0x18] sm:$0xff]  ;;  %v113_v30 = vld [vmem:[#allocation6] sm:$0xff]  ;;  %v114_v31 = vld [vmem:[#allocation6 + $0x8] sm:$0xff] }
  0x1f   :  { %156 = vmatpush.msra.mxu0 %v133_v10  ;;  %1130 = vmatpush.msra.mxu2 %v133_v10  ;;  %v97_v32 = vld [vmem:[#allocation3] sm:$0xff]  ;;  %v98_v33 = vld [vmem:[#allocation3 + $0x8] sm:$0xff]  ;;  %v99_v34 = vld [vmem:[#allocation3 + $0x10] sm:$0xff] }
  0x20   :  { %221 = vmatpush.msra.mxu1 %v134_v11  ;;  %1146 = vmatpush.msra.mxu3 %v134_v11  ;;  %v100_v35 = vld [vmem:[#allocation3 + $0x18] sm:$0xff]  ;;  %v101_v36 = vld [vmem:[#allocation3 + $0x20] sm:$0xff]  ;;  %v106_v37 = vld [vmem:[#allocation3 + $0x48] sm:$0xff] }
  0x21   :  { %157 = vmatpush.msra.mxu0 %v131_v12  ;;  %1131 = vmatpush.msra.mxu2 %v131_v12  ;;  %v343_v38 = vld [vmem:[#allocation8 + $0xf0] sm:$0xff]  ;;  %v344_v39 = vld [vmem:[#allocation8 + $0xf8] sm:$0xff]  ;;  %v341_v40 = vld [vmem:[#allocation8 + $0xe0] sm:$0xff] }
  0x22   :  { %222 = vmatpush.msra.mxu1 %v132_v13  ;;  %1147 = vmatpush.msra.mxu3 %v132_v13  ;;  %v375_v41 = vld [vmem:[#allocation8 + $0x1f0] sm:$0xff]  ;;  %v342_v42 = vld [vmem:[#allocation8 + $0xe8] sm:$0xff]  ;;  %v376_v43 = vld [vmem:[#allocation8 + $0x1f8] sm:$0xff] }
  0x23   :  { %158 = vmatpush.msra.mxu0 %v129_v14  ;;  %1132 = vmatpush.msra.mxu2 %v129_v14  ;;  %v339_v44 = vld [vmem:[#allocation8 + $0xd0] sm:$0xff]  ;;  %v373_v45 = vld [vmem:[#allocation8 + $0x1e0] sm:$0xff]  ;;  %v340_v46 = vld [vmem:[#allocation8 + $0xd8] sm:$0xff] }
  0x24   :  { %223 = vmatpush.msra.mxu1 %v130_v15  ;;  %1148 = vmatpush.msra.mxu3 %v130_v15  ;;  %v374_v47 = vld [vmem:[#allocation8 + $0x1e8] sm:$0xff]  ;;  %v371_v49 = vld [vmem:[#allocation8 + $0x1d0] sm:$0xff]  ;;  %v337_v51 = vld [vmem:[#allocation8 + $0xc0] sm:$0xff] }
  0x25   :  { %159 = vmatpush.msra.mxu0 %v127_v16  ;;  %1133 = vmatpush.msra.mxu2 %v127_v16  ;;  %v102_v48 = vld [vmem:[#allocation3 + $0x28] sm:$0xff]  ;;  %v107_v50 = vld [vmem:[#allocation3 + $0x50] sm:$0xff]  ;;  %v372_v53 = vld [vmem:[#allocation8 + $0x1d8] sm:$0xff] }
  0x26   :  { %224 = vmatpush.msra.mxu1 %v128_v17  ;;  %1149 = vmatpush.msra.mxu3 %v128_v17  ;;  %v338_v52 = vld [vmem:[#allocation8 + $0xc8] sm:$0xff]  ;;  %v335_v54 = vld [vmem:[#allocation8 + $0xb0] sm:$0xff]  ;;  %v369_v55 = vld [vmem:[#allocation8 + $0x1c0] sm:$0xff] }
  0x27   :  { %160 = vmatpush.msra.mxu0 %v125_v18  ;;  %1134 = vmatpush.msra.mxu2 %v125_v18  ;;  %v336_v56 = vld [vmem:[#allocation8 + $0xb8] sm:$0xff]  ;;  %v370_v57 = vld [vmem:[#allocation8 + $0x1c8] sm:$0xff]  ;;  %v367_v58 = vld [vmem:[#allocation8 + $0x1b0] sm:$0xff] }
  0x28   :  { %225 = vmatpush.msra.mxu1 %v126_v19  ;;  %1150 = vmatpush.msra.mxu3 %v126_v19  ;;  %v333_v59 = vld [vmem:[#allocation8 + $0xa0] sm:$0xff]  ;;  %v334_v60 = vld [vmem:[#allocation8 + $0xa8] sm:$0xff]  ;;  %v368_v61 = vld [vmem:[#allocation8 + $0x1b8] sm:$0xff] }
  0x29   :  { %161 = vmatpush.msra.mxu0 %v123_v20  ;;  %1135 = vmatpush.msra.mxu2 %v123_v20  ;;  %v365_v62 = vld [vmem:[#allocation8 + $0x1a0] sm:$0xff]  ;;  %v103_v63 = vld [vmem:[#allocation3 + $0x30] sm:$0xff]  ;;  %v108_v0 = vld [vmem:[#allocation3 + $0x58] sm:$0xff] }
  0x2a   :  { %226 = vmatpush.msra.mxu1 %v124_v21  ;;  %1151 = vmatpush.msra.mxu3 %v124_v21  ;;  %v331_v1 = vld [vmem:[#allocation8 + $0x90] sm:$0xff]  ;;  %v332_v2 = vld [vmem:[#allocation8 + $0x98] sm:$0xff]  ;;  %v366_v3 = vld [vmem:[#allocation8 + $0x1a8] sm:$0xff] }
  0x2b   :  { %162 = vmatpush.msra.mxu0 %v121_v22  ;;  %1136 = vmatpush.msra.mxu2 %v121_v22  ;;  %v363_v4 = vld [vmem:[#allocation8 + $0x190] sm:$0xff]  ;;  %v329_v5 = vld [vmem:[#allocation8 + $0x80] sm:$0xff]  ;;  %v330_v6 = vld [vmem:[#allocation8 + $0x88] sm:$0xff] }
  0x2c   :  { %227 = vmatpush.msra.mxu1 %v122_v23  ;;  %1152 = vmatpush.msra.mxu3 %v122_v23  ;;  %v364_v7 = vld [vmem:[#allocation8 + $0x198] sm:$0xff]  ;;  %v361_v8 = vld [vmem:[#allocation8 + $0x180] sm:$0xff]  ;;  %v327_v9 = vld [vmem:[#allocation8 + $0x70] sm:$0xff] }
  0x2d   :  { %163 = vmatpush.msra.mxu0 %v119_v24  ;;  %1137 = vmatpush.msra.mxu2 %v119_v24  ;;  %v328_v10 = vld [vmem:[#allocation8 + $0x78] sm:$0xff]  ;;  %v362_v11 = vld [vmem:[#allocation8 + $0x188] sm:$0xff]  ;;  %v359_v12 = vld [vmem:[#allocation8 + $0x170] sm:$0xff] }
  0x2e   :  { %228 = vmatpush.msra.mxu1 %v120_v25  ;;  %1153 = vmatpush.msra.mxu3 %v120_v25  ;;  %v104_v13 = vld [vmem:[#allocation3 + $0x38] sm:$0xff]  ;;  %v109_v14 = vld [vmem:[#allocation3 + $0x60] sm:$0xff]  ;;  %v326_v16 = vld [vmem:[#allocation8 + $0x68] sm:$0xff] }
  0x2f   :  { %164 = vmatpush.msra.mxu0 %v117_v26  ;;  %1138 = vmatpush.msra.mxu2 %v117_v26  ;;  %v325_v15 = vld [vmem:[#allocation8 + $0x60] sm:$0xff]  ;;  %v360_v17 = vld [vmem:[#allocation8 + $0x178] sm:$0xff]  ;;  %v323_v19 = vld [vmem:[#allocation8 + $0x50] sm:$0xff] }
  0x30   :  { %229 = vmatpush.msra.mxu1 %v118_v27  ;;  %1154 = vmatpush.msra.mxu3 %v118_v27  ;;  %v357_v18 = vld [vmem:[#allocation8 + $0x160] sm:$0xff]  ;;  %v324_v20 = vld [vmem:[#allocation8 + $0x58] sm:$0xff]  ;;  %v358_v21 = vld [vmem:[#allocation8 + $0x168] sm:$0xff] }
  0x31   :  { %165 = vmatpush.msra.mxu0 %v115_v28  ;;  %1139 = vmatpush.msra.mxu2 %v115_v28  ;;  %v355_v22 = vld [vmem:[#allocation8 + $0x150] sm:$0xff]  ;;  %v321_v23 = vld [vmem:[#allocation8 + $0x40] sm:$0xff]  ;;  %v322_v24 = vld [vmem:[#allocation8 + $0x48] sm:$0xff] }
  0x32   :  { %230 = vmatpush.msra.mxu1 %v116_v29  ;;  %1155 = vmatpush.msra.mxu3 %v116_v29  ;;  %v356_v25 = vld [vmem:[#allocation8 + $0x158] sm:$0xff]  ;;  %v353_v26 = vld [vmem:[#allocation8 + $0x140] sm:$0xff]  ;;  %v110_v28 = vld [vmem:[#allocation3 + $0x68] sm:$0xff] }
  0x33   :  { %166 = vmatpush.msra.mxu0 %v113_v30  ;;  %1140 = vmatpush.msra.mxu2 %v113_v30  ;;  %v105_v27 = vld [vmem:[#allocation3 + $0x40] sm:$0xff]  ;;  %v319_v29 = vld [vmem:[#allocation8 + $0x30] sm:$0xff]  ;;  %v320_v30 = vld [vmem:[#allocation8 + $0x38] sm:$0xff] }
  0x34   :  { %231 = vmatpush.msra.mxu1 %v114_v31  ;;  %167 = vmatmul.f32.vlgmr.msra.gmra.mxu0 %v97_v32 }
  0x35   :  { %232 = vmatmul.f32.vlgmr.msra.gmra.mxu1 %v97_v32  ;;  %1156 = vmatpush.msra.mxu3 %v114_v31  ;;  %v354_v31 = vld [vmem:[#allocation8 + $0x148] sm:$0xff]  ;;  %v111_v32 = vld [vmem:[#allocation3 + $0x70] sm:$0xff] }
  0x36   :  { %194 = vmatmul.f32.vlgmr.msra.gmra.mxu2 %v106_v37  ;;  %259 = vmatmul.f32.vlgmr.msra.gmra.mxu3 %v106_v37  ;;  %v352_v37 = vld [vmem:[#allocation8 + $0x138] sm:$0xff] }
  0x37   :  { %383 = vmatpush.msrb.mxu2 %v343_v38  ;;  %513 = vmatpush.msrb.mxu0 %v344_v39  ;;  %v315_v38 = vld [vmem:[#allocation8 + $0x10] sm:$0xff]  ;;  %v349_v39 = vld [vmem:[#allocation8 + $0x120] sm:$0xff] }
  0x38   :  { %448 = vmatpush.msrb.mxu3 %v375_v41  ;;  %578 = vmatpush.msrb.mxu1 %v376_v43  ;;  %v350_v41 = vld [vmem:[#allocation8 + $0x128] sm:$0xff]  ;;  %v347_v43 = vld [vmem:[#allocation8 + $0x110] sm:$0xff] }
  0x39   :  { %384 = vmatpush.msrb.mxu2 %v341_v40  ;;  %514 = vmatpush.msrb.mxu0 %v342_v42  ;;  %v316_v40 = vld [vmem:[#allocation8 + $0x18] sm:$0xff]  ;;  %v313_v42 = vld [vmem:[#allocation8] sm:$0xff] }
  0x3a   :  { %449 = vmatpush.msrb.mxu3 %v373_v45  ;;  %579 = vmatpush.msrb.mxu1 %v374_v47  ;;  %v348_v45 = vld [vmem:[#allocation8 + $0x118] sm:$0xff]  ;;  %v346_v47 = vld [vmem:[#allocation8 + $0x108] sm:$0xff] }
  0x3b   :  { %385 = vmatpush.msrb.mxu2 %v339_v44  ;;  %515 = vmatpush.msrb.mxu0 %v340_v46  ;;  %v314_v44 = vld [vmem:[#allocation8 + $0x8] sm:$0xff]  ;;  %v345_v46 = vld [vmem:[#allocation8 + $0x100] sm:$0xff] }
  0x3c   :  { %170 = vmatmul.f32.gmra.mxu0 %v98_v33  ;;  %450 = vmatpush.msrb.mxu3 %v371_v49 }
  0x3d   :  { %235 = vmatmul.f32.gmra.mxu1 %v98_v33  ;;  %386 = vmatpush.msrb.mxu2 %v337_v51  ;;  %v112_v33 = vld [vmem:[#allocation3 + $0x78] sm:$0xff] }
  0x3e   :  { %197 = vmatmul.f32.gmra.mxu2 %v107_v50  ;;  %262 = vmatmul.f32.gmra.mxu3 %v107_v50 }
  0x3f   :  { %516 = vmatpush.msrb.mxu0 %v338_v52  ;;  %580 = vmatpush.msrb.mxu1 %v372_v53 }
  0x40   :  { %451 = vmatpush.msrb.mxu3 %v369_v55  ;;  %387 = vmatpush.msrb.mxu2 %v335_v54 }
  0x41   :  { %517 = vmatpush.msrb.mxu0 %v336_v56  ;;  %581 = vmatpush.msrb.mxu1 %v370_v57 }
  0x42   :  { %452 = vmatpush.msrb.mxu3 %v367_v58  ;;  %388 = vmatpush.msrb.mxu2 %v333_v59 }
  0x43   :  { %518 = vmatpush.msrb.mxu0 %v334_v60  ;;  %582 = vmatpush.msrb.mxu1 %v368_v61 }
  0x44   :  { %173 = vmatmul.f32.gmra.mxu0 %v99_v34  ;;  %453 = vmatpush.msrb.mxu3 %v365_v62 }
  0x45   :  { %238 = vmatmul.f32.gmra.mxu1 %v99_v34  ;;  %389 = vmatpush.msrb.mxu2 %v331_v1  ;;  %v317_v34 = vld [vmem:[#allocation8 + $0x20] sm:$0xff] }
  0x46   :  { %200 = vmatmul.f32.gmra.mxu2 %v108_v0  ;;  %265 = vmatmul.f32.gmra.mxu3 %v108_v0 }
  0x47   :  { %519 = vmatpush.msrb.mxu0 %v332_v2  ;;  %583 = vmatpush.msrb.mxu1 %v366_v3 }
  0x48   :  { %454 = vmatpush.msrb.mxu3 %v363_v4  ;;  %390 = vmatpush.msrb.mxu2 %v329_v5 }
  0x49   :  { %520 = vmatpush.msrb.mxu0 %v330_v6  ;;  %584 = vmatpush.msrb.mxu1 %v364_v7 }
  0x4a   :  { %455 = vmatpush.msrb.mxu3 %v361_v8  ;;  %391 = vmatpush.msrb.mxu2 %v327_v9 }
  0x4b   :  { %521 = vmatpush.msrb.mxu0 %v328_v10  ;;  %585 = vmatpush.msrb.mxu1 %v362_v11 }
  0x4c   :  { %176 = vmatmul.f32.gmra.mxu0 %v100_v35  ;;  %456 = vmatpush.msrb.mxu3 %v359_v12 }
  0x4d   :  { %241 = vmatmul.f32.gmra.mxu1 %v100_v35  ;;  %392 = vmatpush.msrb.mxu2 %v325_v15  ;;  %v351_v35 = vld [vmem:[#allocation8 + $0x130] sm:$0xff] }
  0x4e   :  { %203 = vmatmul.f32.gmra.mxu2 %v109_v14  ;;  %268 = vmatmul.f32.gmra.mxu3 %v109_v14 }
  0x4f   :  { %522 = vmatpush.msrb.mxu0 %v326_v16  ;;  %586 = vmatpush.msrb.mxu1 %v360_v17 }
  0x50   :  { %457 = vmatpush.msrb.mxu3 %v357_v18  ;;  %393 = vmatpush.msrb.mxu2 %v323_v19 }
  0x51   :  { %523 = vmatpush.msrb.mxu0 %v324_v20  ;;  %587 = vmatpush.msrb.mxu1 %v358_v21 }
  0x52   :  { %458 = vmatpush.msrb.mxu3 %v355_v22  ;;  %394 = vmatpush.msrb.mxu2 %v321_v23  ;;  %v705_v23 = vld [vmem:[#allocation9 + $0xf0] sm:$0xff] }
  0x53   :  { %524 = vmatpush.msrb.mxu0 %v322_v24  ;;  %588 = vmatpush.msrb.mxu1 %v356_v25  ;;  %v737_v24 = vld [vmem:[#allocation9 + $0x1f0] sm:$0xff] }
  0x54   :  { %179 = vmatmul.f32.gmra.mxu0 %v101_v36  ;;  %459 = vmatpush.msrb.mxu3 %v353_v26 }
  0x55   :  { %244 = vmatmul.f32.gmra.mxu1 %v101_v36  ;;  %395 = vmatpush.msrb.mxu2 %v319_v29  ;;  %v318_v36 = vld [vmem:[#allocation8 + $0x28] sm:$0xff] }
  0x56   :  { %206 = vmatmul.f32.gmra.mxu2 %v110_v28  ;;  %271 = vmatmul.f32.gmra.mxu3 %v110_v28 }
  0x57   :  { %525 = vmatpush.msrb.mxu0 %v320_v30  ;;  %589 = vmatpush.msrb.mxu1 %v354_v31 }
  0x58   :  { %396 = vmatpush.msrb.mxu2 %v317_v34  ;;  %460 = vmatpush.msrb.mxu3 %v351_v35  ;;  %v735_v34 = vld [vmem:[#allocation9 + $0x1e0] sm:$0xff] }
  0x59   :  { %526 = vmatpush.msrb.mxu0 %v318_v36  ;;  %590 = vmatpush.msrb.mxu1 %v352_v37  ;;  %v738_v36 = vld [vmem:[#allocation9 + $0x1f8] sm:$0xff] }
  0x5a   :  { %397 = vmatpush.msrb.mxu2 %v315_v38  ;;  %461 = vmatpush.msrb.mxu3 %v349_v39 }
  0x5b   :  { %527 = vmatpush.msrb.mxu0 %v316_v40  ;;  %591 = vmatpush.msrb.mxu1 %v350_v41 }
  0x5c   :  { %182 = vmatmul.f32.gmra.mxu0 %v102_v48  ;;  %398 = vmatpush.msrb.mxu2 %v313_v42 }
  0x5d   :  { %247 = vmatmul.f32.gmra.mxu1 %v102_v48  ;;  %462 = vmatpush.msrb.mxu3 %v347_v43  ;;  %v145_v48 = vld [vmem:[%s1560_s2] sm:$0x3]  ;;  %v701_v43 = vld [vmem:[#allocation9 + $0xd0] sm:$0xff] }
  0x5e   :  { %209 = vmatmul.f32.gmra.mxu2 %v111_v32  ;;  %274 = vmatmul.f32.gmra.mxu3 %v111_v32  ;;  %v1372_v49 = vperm.slane %v145_v48, 0  ;;  %v1374_v50 = vperm.slane %v145_v48, 1  ;;  %v703_v32 = vld [vmem:[#allocation9 + $0xe0] sm:$0xff] }
  0x5f   :  { %528 = vmatpush.msrb.mxu0 %v314_v44  ;;  %592 = vmatpush.msrb.mxu1 %v348_v45  ;;  %v704_v44 = vld [vmem:[#allocation9 + $0xe8] sm:$0xff]  ;;  %v733_v45 = vld [vmem:[#allocation9 + $0x1d0] sm:$0xff] }
  0x60   :  { %463 = vmatpush.msrb.mxu3 %v345_v46  ;;  %745 = vmatpush.msra.mxu2 %v705_v23  ;;  %v724_v23 = vld [vmem:[#allocation9 + $0x188] sm:$0xff] }
  0x61   :  { %593 = vmatpush.msrb.mxu1 %v346_v47  ;;  %v736_v47 = vld [vmem:[#allocation9 + $0x1e8] sm:$0xff] }
  0x62   :  { %810 = vmatpush.msra.mxu3 %v737_v24  ;;  %746 = vmatpush.msra.mxu2 %v703_v32  ;;  %v696_v24 = vld [vmem:[#allocation9 + $0xa8] sm:$0xff] }
  0x63   :  { %940 = vmatpush.msra.mxu1 %v738_v36  ;;  %v720_v32 = vld [vmem:[#allocation9 + $0x168] sm:$0xff] }
  0x64   :  { %185 = vmatmul.f32.gmra.mxu0 %v103_v63  ;;  %811 = vmatpush.msra.mxu3 %v735_v34  ;;  %v691_v34 = vld [vmem:[#allocation9 + $0x80] sm:$0xff] }
  0x65   :  { %250 = vmatmul.f32.gmra.mxu1 %v103_v63  ;;  %747 = vmatpush.msra.mxu2 %v701_v43  ;;  %v715_v43 = vld [vmem:[#allocation9 + $0x140] sm:$0xff] }
  0x66   :  { %212 = vmatmul.f32.gmra.mxu2 %v112_v33  ;;  %277 = vmatmul.f32.gmra.mxu3 %v112_v33  ;;  %v706_v33 = vld [vmem:[#allocation9 + $0xf8] sm:$0xff] }
  0x67   :  { %875 = vmatpush.msra.mxu0 %v706_v33  ;;  %812 = vmatpush.msra.mxu3 %v733_v45 }
  0x68   :  { %941 = vmatpush.msra.mxu1 %v736_v47  ;;  %v688_v47 = vld [vmem:[#allocation9 + $0x68] sm:$0xff] }
  0x69   :  { %876 = vmatpush.msra.mxu0 %v704_v44  ;;  %v716_v44 = vld [vmem:[#allocation9 + $0x148] sm:$0xff] }
  0x6c   :  { %188 = vmatmul.f32.gmra.mxu0 %v104_v13 }
  0x6d   :  { %253 = vmatmul.f32.gmra.mxu1 %v104_v13 }
  0x74   :  { %191 = vmatmul.f32.gmra.mxu0 %v105_v27 }
  0x75   :  { %256 = vmatmul.f32.gmra.mxu1 %v105_v27 }
  0xb1   :  { %v168_v51 = vpop.f32.mrf.mxu0 }
  0xb2   :  { %v233_v52 = vpop.f32.mrf.mxu1  ;;  %v169_v53 = vadd.f32 %v168_v51, %v1372_v49 }
  0xb3   :  { %v234_v54 = vadd.f32 %v233_v52, %v1374_v50 }
  0xb4   :  { %v281_v55 = vmax.f32 %v169_v53, 0.0 }
  0xb5   :  { %v282_v56 = vmax.f32 %v234_v54, 0.0 }
  0xb6   :  { %399 = vmatmul.f32.vlgmr.msrb.gmra.mxu2 %v281_v55  ;;  %529 = vmatmul.f32.vlgmr.msrb.gmra.mxu0 %v281_v55 }
  0xb7   :  { %464 = vmatmul.f32.vlgmr.msrb.gmra.mxu3 %v282_v56  ;;  %594 = vmatmul.f32.vlgmr.msrb.gmra.mxu1 %v282_v56 }
  0xb9   :  { %v171_v57 = vpop.f32.mrf.mxu0  ;;  %v195_v31 = vpop.f32.mrf.mxu2 }
  0xba   :  { %v236_v58 = vpop.f32.mrf.mxu1  ;;  %v172_v59 = vadd.f32 %v171_v57, %v1372_v49  ;;  %v260_v35 = vpop.f32.mrf.mxu3  ;;  %v196_v57 = vadd.f32 %v195_v31, %v1372_v49  ;;  %v719_v31 = vld [vmem:[#allocation9 + $0x160] sm:$0xff] }
  0xbb   :  { %v237_v60 = vadd.f32 %v236_v58, %v1374_v50  ;;  %v261_v58 = vadd.f32 %v260_v35, %v1374_v50  ;;  %v692_v35 = vld [vmem:[#allocation9 + $0x88] sm:$0xff] }
  0xbc   :  { %v283_v61 = vmax.f32 %v172_v59, 0.0  ;;  %v699_v59 = vld [vmem:[#allocation9 + $0xc0] sm:$0xff] }
  0xbd   :  { %v284_v62 = vmax.f32 %v237_v60, 0.0  ;;  %v702_v60 = vld [vmem:[#allocation9 + $0xd8] sm:$0xff]  ;;  %748 = vmatpush.msra.mxu2 %v699_v59  ;;  %v683_v59 = vld [vmem:[#allocation9 + $0x40] sm:$0xff] }
  0xbe   :  { %402 = vmatmul.f32.gmra.mxu2 %v283_v61  ;;  %532 = vmatmul.f32.gmra.mxu0 %v283_v61  ;;  %v731_v61 = vld [vmem:[#allocation9 + $0x1c0] sm:$0xff] }
  0xbf   :  { %467 = vmatmul.f32.gmra.mxu3 %v284_v62  ;;  %597 = vmatmul.f32.gmra.mxu1 %v284_v62  ;;  %v734_v62 = vld [vmem:[#allocation9 + $0x1d8] sm:$0xff] }
  0xc0   :  { %877 = vmatpush.msra.mxu0 %v702_v60  ;;  %813 = vmatpush.msra.mxu3 %v731_v61  ;;  %v684_v60 = vld [vmem:[#allocation9 + $0x48] sm:$0xff] }
  0xc1   :  { %v174_v63 = vpop.f32.mrf.mxu0  ;;  %v198_v46 = vpop.f32.mrf.mxu2  ;;  %942 = vmatpush.msra.mxu1 %v734_v62  ;;  %v709_v62 = vld [vmem:[#allocation9 + $0x110] sm:$0xff] }
  0xc2   :  { %v239_v0 = vpop.f32.mrf.mxu1  ;;  %v175_v1 = vadd.f32 %v174_v63, %v1372_v49  ;;  %v263_v54 = vpop.f32.mrf.mxu3  ;;  %v299_v63 = vmax.f32 %v196_v57, 0.0  ;;  %v711_v57 = vld [vmem:[#allocation9 + $0x120] sm:$0xff] }
  0xc3   :  { %v240_v2 = vadd.f32 %v239_v0, %v1374_v50  ;;  %v300_v0 = vmax.f32 %v261_v58, 0.0  ;;  %v712_v58 = vld [vmem:[#allocation9 + $0x128] sm:$0xff] }
  0xc4   :  { %v285_v3 = vmax.f32 %v175_v1, 0.0 }
  0xc5   :  { %v286_v4 = vmax.f32 %v240_v2, 0.0 }
  0xc6   :  { %405 = vmatmul.f32.gmra.mxu2 %v285_v3  ;;  %535 = vmatmul.f32.gmra.mxu0 %v285_v3  ;;  %v199_v3 = vadd.f32 %v198_v46, %v1372_v49  ;;  %v687_v46 = vld [vmem:[#allocation9 + $0x60] sm:$0xff] }
  0xc7   :  { %470 = vmatmul.f32.gmra.mxu3 %v286_v4  ;;  %600 = vmatmul.f32.gmra.mxu1 %v286_v4  ;;  %v264_v4 = vadd.f32 %v263_v54, %v1374_v50  ;;  %v685_v54 = vld [vmem:[#allocation9 + $0x50] sm:$0xff] }
  0xc9   :  { %v177_v5 = vpop.f32.mrf.mxu0  ;;  %v201_v1 = vpop.f32.mrf.mxu2 }
  0xca   :  { %v242_v6 = vpop.f32.mrf.mxu1  ;;  %v178_v7 = vadd.f32 %v177_v5, %v1372_v49  ;;  %v266_v2 = vpop.f32.mrf.mxu3  ;;  %v697_v5 = vld [vmem:[#allocation9 + $0xb0] sm:$0xff] }
  0xcb   :  { %v243_v8 = vadd.f32 %v242_v6, %v1374_v50  ;;  %v700_v6 = vld [vmem:[#allocation9 + $0xc8] sm:$0xff]  ;;  %749 = vmatpush.msra.mxu2 %v697_v5  ;;  %v707_v5 = vld [vmem:[#allocation9 + $0x100] sm:$0xff] }
  0xcc   :  { %v287_v9 = vmax.f32 %v178_v7, 0.0  ;;  %v732_v7 = vld [vmem:[#allocation9 + $0x1c8] sm:$0xff]  ;;  %878 = vmatpush.msra.mxu0 %v700_v6 }
  0xcd   :  { %v288_v10 = vmax.f32 %v243_v8, 0.0  ;;  %v729_v8 = vld [vmem:[#allocation9 + $0x1b0] sm:$0xff]  ;;  %943 = vmatpush.msra.mxu1 %v732_v7  ;;  %v708_v6 = vld [vmem:[#allocation9 + $0x108] sm:$0xff] }
  0xce   :  { %408 = vmatmul.f32.gmra.mxu2 %v287_v9  ;;  %538 = vmatmul.f32.gmra.mxu0 %v287_v9  ;;  %v730_v9 = vld [vmem:[#allocation9 + $0x1b8] sm:$0xff] }
  0xcf   :  { %473 = vmatmul.f32.gmra.mxu3 %v288_v10  ;;  %603 = vmatmul.f32.gmra.mxu1 %v288_v10  ;;  %v727_v10 = vld [vmem:[#allocation9 + $0x1a0] sm:$0xff] }
  0xd0   :  { %814 = vmatpush.msra.mxu3 %v729_v8  ;;  %944 = vmatpush.msra.mxu1 %v730_v9  ;;  %v679_v8 = vld [vmem:[#allocation9 + $0x20] sm:$0xff]  ;;  %v680_v9 = vld [vmem:[#allocation9 + $0x28] sm:$0xff] }
  0xd1   :  { %v180_v11 = vpop.f32.mrf.mxu0 }
  0xd2   :  { %v245_v12 = vpop.f32.mrf.mxu1  ;;  %v181_v13 = vadd.f32 %v180_v11, %v1372_v49  ;;  %v301_v11 = vmax.f32 %v199_v3, 0.0  ;;  %815 = vmatpush.msra.mxu3 %v727_v10  ;;  %v682_v3 = vld [vmem:[#allocation9 + $0x38] sm:$0xff] }
  0xd3   :  { %v246_v14 = vadd.f32 %v245_v12, %v1374_v50  ;;  %v728_v12 = vld [vmem:[#allocation9 + $0x1a8] sm:$0xff] }
  0xd4   :  { %v289_v15 = vmax.f32 %v181_v13, 0.0  ;;  %v302_v13 = vmax.f32 %v264_v4, 0.0  ;;  %945 = vmatpush.msra.mxu1 %v728_v12  ;;  %v678_v12 = vld [vmem:[#allocation9 + $0x18] sm:$0xff] }
  0xd5   :  { %v290_v16 = vmax.f32 %v246_v14, 0.0  ;;  %v204_v14 = vpop.f32.mrf.mxu2 }
  0xd6   :  { %411 = vmatmul.f32.gmra.mxu2 %v289_v15  ;;  %541 = vmatmul.f32.gmra.mxu0 %v289_v15  ;;  %v202_v15 = vadd.f32 %v201_v1, %v1372_v49  ;;  %v205_v33 = vadd.f32 %v204_v14, %v1372_v49  ;;  %v675_v14 = vld [vmem:[#allocation9] sm:$0xff] }
  0xd7   :  { %476 = vmatmul.f32.gmra.mxu3 %v290_v16  ;;  %606 = vmatmul.f32.gmra.mxu1 %v290_v16  ;;  %v269_v16 = vpop.f32.mrf.mxu3 }
  0xd8   :  { %v270_v36 = vadd.f32 %v269_v16, %v1374_v50  ;;  %v305_v45 = vmax.f32 %v205_v33, 0.0 }
  0xd9   :  { %v183_v17 = vpop.f32.mrf.mxu0 }
  0xda   :  { %v248_v18 = vpop.f32.mrf.mxu1  ;;  %v184_v19 = vadd.f32 %v183_v17, %v1372_v49  ;;  %v725_v17 = vld [vmem:[#allocation9 + $0x190] sm:$0xff] }
  0xdb   :  { %v249_v20 = vadd.f32 %v248_v18, %v1374_v50  ;;  %v726_v18 = vld [vmem:[#allocation9 + $0x198] sm:$0xff]  ;;  %816 = vmatpush.msra.mxu3 %v725_v17 }
  0xdc   :  { %v291_v21 = vmax.f32 %v184_v19, 0.0  ;;  %v267_v19 = vadd.f32 %v266_v2, %v1374_v50  ;;  %946 = vmatpush.msra.mxu1 %v726_v18  ;;  %v681_v2 = vld [vmem:[#allocation9 + $0x30] sm:$0xff] }
  0xdd   :  { %v292_v22 = vmax.f32 %v249_v20, 0.0  ;;  %v695_v20 = vld [vmem:[#allocation9 + $0xa0] sm:$0xff] }
  0xde   :  { %414 = vmatmul.f32.gmra.mxu2 %v291_v21  ;;  %544 = vmatmul.f32.gmra.mxu0 %v291_v21  ;;  %v723_v21 = vld [vmem:[#allocation9 + $0x180] sm:$0xff] }
  0xdf   :  { %479 = vmatmul.f32.gmra.mxu3 %v292_v22  ;;  %609 = vmatmul.f32.gmra.mxu1 %v292_v22  ;;  %v698_v22 = vld [vmem:[#allocation9 + $0xb8] sm:$0xff] }
  0xe0   :  { %750 = vmatpush.msra.mxu2 %v695_v20  ;;  %879 = vmatpush.msra.mxu0 %v698_v22 }
  0xe1   :  { %v186_v25 = vpop.f32.mrf.mxu0  ;;  %817 = vmatpush.msra.mxu3 %v723_v21  ;;  %947 = vmatpush.msra.mxu1 %v724_v23  ;;  %v377_v23 = vld [vmem:[%s1562_s4] sm:$0x3] }
  0xe2   :  { %v251_v26 = vpop.f32.mrf.mxu1  ;;  %v187_v27 = vadd.f32 %v186_v25, %v1372_v49  ;;  %v721_v25 = vld [vmem:[#allocation9 + $0x170] sm:$0xff]  ;;  %880 = vmatpush.msra.mxu0 %v696_v24  ;;  %v1411_v24 = vperm.slane %v377_v23, 1 }
  0xe3   :  { %v252_v28 = vadd.f32 %v251_v26, %v1374_v50  ;;  %v722_v26 = vld [vmem:[#allocation9 + $0x178] sm:$0xff]  ;;  %818 = vmatpush.msra.mxu3 %v721_v25 }
  0xe4   :  { %v293_v29 = vmax.f32 %v187_v27, 0.0  ;;  %v693_v27 = vld [vmem:[#allocation9 + $0x90] sm:$0xff]  ;;  %948 = vmatpush.msra.mxu1 %v722_v26 }
  0xe5   :  { %v294_v30 = vmax.f32 %v252_v28, 0.0  ;;  %v303_v28 = vmax.f32 %v202_v15, 0.0  ;;  %751 = vmatpush.msra.mxu2 %v693_v27  ;;  %819 = vmatpush.msra.mxu3 %v719_v31  ;;  %v676_v15 = vld [vmem:[#allocation9 + $0x8] sm:$0xff] }
  0xe6   :  { %417 = vmatmul.f32.gmra.mxu2 %v293_v29  ;;  %547 = vmatmul.f32.gmra.mxu0 %v293_v29  ;;  %v694_v29 = vld [vmem:[#allocation9 + $0x98] sm:$0xff] }
  0xe7   :  { %482 = vmatmul.f32.gmra.mxu3 %v294_v30  ;;  %612 = vmatmul.f32.gmra.mxu1 %v294_v30  ;;  %v304_v30 = vmax.f32 %v267_v19, 0.0 }
  0xe8   :  { %881 = vmatpush.msra.mxu0 %v694_v29  ;;  %949 = vmatpush.msra.mxu1 %v720_v32 }
  0xe9   :  { %v189_v37 = vpop.f32.mrf.mxu0  ;;  %752 = vmatpush.msra.mxu2 %v691_v34 }
  0xea   :  { %v254_v38 = vpop.f32.mrf.mxu1  ;;  %v190_v39 = vadd.f32 %v189_v37, %v1372_v49  ;;  %v207_v37 = vpop.f32.mrf.mxu2  ;;  %882 = vmatpush.msra.mxu0 %v692_v35 }
  0xeb   :  { %v255_v40 = vadd.f32 %v254_v38, %v1374_v50  ;;  %v717_v38 = vld [vmem:[#allocation9 + $0x150] sm:$0xff] }
  0xec   :  { %v295_v41 = vmax.f32 %v190_v39, 0.0  ;;  %v718_v39 = vld [vmem:[#allocation9 + $0x158] sm:$0xff]  ;;  %820 = vmatpush.msra.mxu3 %v717_v38 }
  0xed   :  { %v296_v42 = vmax.f32 %v255_v40, 0.0  ;;  %v272_v40 = vpop.f32.mrf.mxu3  ;;  %950 = vmatpush.msra.mxu1 %v718_v39 }
  0xee   :  { %420 = vmatmul.f32.gmra.mxu2 %v295_v41  ;;  %550 = vmatmul.f32.gmra.mxu0 %v295_v41  ;;  %v689_v41 = vld [vmem:[#allocation9 + $0x70] sm:$0xff] }
  0xef   :  { %485 = vmatmul.f32.gmra.mxu3 %v296_v42  ;;  %615 = vmatmul.f32.gmra.mxu1 %v296_v42  ;;  %v690_v42 = vld [vmem:[#allocation9 + $0x78] sm:$0xff] }
  0xf0   :  { %753 = vmatpush.msra.mxu2 %v689_v41  ;;  %883 = vmatpush.msra.mxu0 %v690_v42 }
  0xf1   :  { %v192_v48 = vpop.f32.mrf.mxu0  ;;  %821 = vmatpush.msra.mxu3 %v715_v43  ;;  %951 = vmatpush.msra.mxu1 %v716_v44 }
  0xf2   :  { %v257_v51 = vpop.f32.mrf.mxu1  ;;  %v193_v52 = vadd.f32 %v192_v48, %v1372_v49  ;;  %v306_v48 = vmax.f32 %v270_v36, 0.0  ;;  %754 = vmatpush.msra.mxu2 %v687_v46  ;;  %884 = vmatpush.msra.mxu0 %v688_v47  ;;  %v210_v61 = vpop.f32.mrf.mxu2 }
  0xf3   :  { %v258_v53 = vadd.f32 %v257_v51, %v1374_v50  ;;  %v713_v51 = vld [vmem:[#allocation9 + $0x130] sm:$0xff]  ;;  %v211_v7 = vadd.f32 %v210_v61, %v1372_v49 }
  0xf4   :  { %v297_v55 = vmax.f32 %v193_v52, 0.0  ;;  %v714_v52 = vld [vmem:[#allocation9 + $0x138] sm:$0xff]  ;;  %822 = vmatpush.msra.mxu3 %v713_v51  ;;  %755 = vmatpush.msra.mxu2 %v685_v54 }
  0xf5   :  { %v298_v56 = vmax.f32 %v258_v53, 0.0  ;;  %v208_v53 = vadd.f32 %v207_v37, %v1372_v49  ;;  %952 = vmatpush.msra.mxu1 %v714_v52  ;;  %v275_v1 = vpop.f32.mrf.mxu3 }
  0xf6   :  { %423 = vmatmul.f32.gmra.mxu2 %v297_v55  ;;  %553 = vmatmul.f32.gmra.mxu0 %v297_v55  ;;  %v686_v55 = vld [vmem:[#allocation9 + $0x58] sm:$0xff]  ;;  %v276_v10 = vadd.f32 %v275_v1, %v1374_v50 }
  0xf7   :  { %488 = vmatmul.f32.gmra.mxu3 %v298_v56  ;;  %618 = vmatmul.f32.gmra.mxu1 %v298_v56  ;;  %v273_v56 = vadd.f32 %v272_v40, %v1374_v50 }
  0xf8   :  { %885 = vmatpush.msra.mxu0 %v686_v55  ;;  %823 = vmatpush.msra.mxu3 %v711_v57  ;;  %v310_v16 = vmax.f32 %v276_v10, 0.0 }
  0xf9   :  { %953 = vmatpush.msra.mxu1 %v712_v58  ;;  %v308_v4 = vmax.f32 %v273_v56, 0.0  ;;  %756 = vmatpush.msra.mxu2 %v683_v59 }
  0xfa   :  { %886 = vmatpush.msra.mxu0 %v684_v60  ;;  %824 = vmatpush.msra.mxu3 %v709_v62  ;;  %v213_v17 = vpop.f32.mrf.mxu2 }
  0xfb   :  { %757 = vmatpush.msra.mxu2 %v681_v2  ;;  %v214_v19 = vadd.f32 %v213_v17, %v1372_v49 }
  0xfc   :  { %887 = vmatpush.msra.mxu0 %v682_v3  ;;  %825 = vmatpush.msra.mxu3 %v707_v5 }
  0xfd   :  { %758 = vmatpush.msra.mxu2 %v679_v8  ;;  %v278_v18 = vpop.f32.mrf.mxu3  ;;  %v311_v21 = vmax.f32 %v214_v19, 0.0 }
  0xfe   :  { %426 = vmatmul.f32.gmra.mxu2 %v299_v63  ;;  %556 = vmatmul.f32.gmra.mxu0 %v299_v63  ;;  %v710_v63 = vld [vmem:[#allocation9 + $0x118] sm:$0xff]  ;;  %v279_v20 = vadd.f32 %v278_v18, %v1374_v50 }
  0xff   :  { %491 = vmatmul.f32.gmra.mxu3 %v300_v0  ;;  %621 = vmatmul.f32.gmra.mxu1 %v300_v0  ;;  %v307_v0 = vmax.f32 %v208_v53, 0.0 }
 0x100   :  { %954 = vmatpush.msra.mxu1 %v710_v63  ;;  %888 = vmatpush.msra.mxu0 %v680_v9  ;;  %v312_v22 = vmax.f32 %v279_v20, 0.0 }
 0x102   :  { %955 = vmatpush.msra.mxu1 %v708_v6  ;;  %889 = vmatpush.msra.mxu0 %v678_v12 }
 0x104   :  { %890 = vmatpush.msra.mxu0 %v676_v15 }
 0x106   :  { %429 = vmatmul.f32.gmra.mxu2 %v301_v11  ;;  %559 = vmatmul.f32.gmra.mxu0 %v301_v11  ;;  %v677_v11 = vld [vmem:[#allocation9 + $0x10] sm:$0xff] }
 0x107   :  { %494 = vmatmul.f32.gmra.mxu3 %v302_v13  ;;  %624 = vmatmul.f32.gmra.mxu1 %v302_v13  ;;  %v309_v13 = vmax.f32 %v211_v7, 0.0 }
 0x108   :  { %759 = vmatpush.msra.mxu2 %v677_v11 }
 0x10a   :  { %760 = vmatpush.msra.mxu2 %v675_v14 }
 0x10e   :  { %432 = vmatmul.f32.gmra.mxu2 %v303_v28  ;;  %562 = vmatmul.f32.gmra.mxu0 %v303_v28  ;;  %v1414_v28 = vperm.slane %v377_v23, 0 }
 0x10f   :  { %497 = vmatmul.f32.gmra.mxu3 %v304_v30  ;;  %627 = vmatmul.f32.gmra.mxu1 %v304_v30 }
 0x116   :  { %435 = vmatmul.f32.gmra.mxu2 %v305_v45  ;;  %565 = vmatmul.f32.gmra.mxu0 %v305_v45 }
 0x117   :  { %500 = vmatmul.f32.gmra.mxu3 %v306_v48  ;;  %630 = vmatmul.f32.gmra.mxu1 %v306_v48 }
 0x11e   :  { %438 = vmatmul.f32.gmra.mxu2 %v307_v0  ;;  %568 = vmatmul.f32.gmra.mxu0 %v307_v0 }
 0x11f   :  { %503 = vmatmul.f32.gmra.mxu3 %v308_v4  ;;  %633 = vmatmul.f32.gmra.mxu1 %v308_v4 }
 0x126   :  { %441 = vmatmul.f32.gmra.mxu2 %v309_v13  ;;  %571 = vmatmul.f32.gmra.mxu0 %v309_v13 }
 0x127   :  { %506 = vmatmul.f32.gmra.mxu3 %v310_v16  ;;  %636 = vmatmul.f32.gmra.mxu1 %v310_v16 }
 0x12e   :  { %444 = vmatmul.f32.gmra.mxu2 %v311_v21  ;;  %574 = vmatmul.f32.gmra.mxu0 %v311_v21 }
 0x12f   :  { %509 = vmatmul.f32.gmra.mxu3 %v312_v22  ;;  %639 = vmatmul.f32.gmra.mxu1 %v312_v22 }
 0x133   :  { %v530_v25 = vpop.f32.mrf.mxu0 }
 0x134   :  { %v531_v26 = vadd.f32 %v530_v25, %v1411_v24  ;;  %v595_v49 = vpop.f32.mrf.mxu1 }
 0x136   :  { %v596_v27 = vadd.f32 %v595_v49, %v531_v26 }
 0x138   :  { %v644_v50 = vmax.f32 %v596_v27, 0.0 }
 0x139   :  { %v400_v29 = vpop.f32.mrf.mxu2 }
 0x13a   :  { %v401_v30 = vadd.f32 %v400_v29, %v1414_v28  ;;  %826 = vmatmul.f32.vlgmr.msra.gmra.mxu3 %v644_v50  ;;  %956 = vmatmul.f32.vlgmr.msra.gmra.mxu1 %v644_v50  ;;  %v465_v31 = vpop.f32.mrf.mxu3 }
 0x13b   :  { %v533_v32 = vpop.f32.mrf.mxu0 }
 0x13c   :  { %v466_v33 = vadd.f32 %v465_v31, %v401_v30  ;;  %v534_v34 = vadd.f32 %v533_v32, %v1411_v24  ;;  %v598_v35 = vpop.f32.mrf.mxu1 }
 0x13e   :  { %v643_v36 = vmax.f32 %v466_v33, 0.0  ;;  %v599_v37 = vadd.f32 %v598_v35, %v534_v34 }
 0x140   :  { %v646_v38 = vmax.f32 %v599_v37, 0.0  ;;  %761 = vmatmul.f32.vlgmr.msra.gmra.mxu2 %v643_v36  ;;  %891 = vmatmul.f32.vlgmr.msra.gmra.mxu0 %v643_v36 }
 0x141   :  { %v403_v39 = vpop.f32.mrf.mxu2 }
 0x142   :  { %v404_v40 = vadd.f32 %v403_v39, %v1414_v28  ;;  %829 = vmatmul.f32.gmra.mxu3 %v646_v38  ;;  %959 = vmatmul.f32.gmra.mxu1 %v646_v38  ;;  %v468_v41 = vpop.f32.mrf.mxu3 }
 0x143   :  { %v536_v42 = vpop.f32.mrf.mxu0 }
 0x144   :  { %v469_v43 = vadd.f32 %v468_v41, %v404_v40  ;;  %v537_v44 = vadd.f32 %v536_v42, %v1411_v24  ;;  %v601_v45 = vpop.f32.mrf.mxu1 }
 0x146   :  { %v645_v46 = vmax.f32 %v469_v43, 0.0  ;;  %v602_v47 = vadd.f32 %v601_v45, %v537_v44 }
 0x148   :  { %v648_v48 = vmax.f32 %v602_v47, 0.0  ;;  %764 = vmatmul.f32.gmra.mxu2 %v645_v46  ;;  %894 = vmatmul.f32.gmra.mxu0 %v645_v46 }
 0x149   :  { %v406_v51 = vpop.f32.mrf.mxu2 }
 0x14a   :  { %v407_v52 = vadd.f32 %v406_v51, %v1414_v28  ;;  %832 = vmatmul.f32.gmra.mxu3 %v648_v48  ;;  %962 = vmatmul.f32.gmra.mxu1 %v648_v48  ;;  %v471_v53 = vpop.f32.mrf.mxu3 }
 0x14b   :  { %v539_v54 = vpop.f32.mrf.mxu0 }
 0x14c   :  { %v472_v55 = vadd.f32 %v471_v53, %v407_v52  ;;  %v540_v56 = vadd.f32 %v539_v54, %v1411_v24  ;;  %v604_v57 = vpop.f32.mrf.mxu1 }
 0x14e   :  { %v647_v58 = vmax.f32 %v472_v55, 0.0  ;;  %v605_v59 = vadd.f32 %v604_v57, %v540_v56 }
 0x150   :  { %v650_v60 = vmax.f32 %v605_v59, 0.0  ;;  %767 = vmatmul.f32.gmra.mxu2 %v647_v58  ;;  %897 = vmatmul.f32.gmra.mxu0 %v647_v58 }
 0x151   :  { %v409_v61 = vpop.f32.mrf.mxu2 }
 0x152   :  { %v410_v62 = vadd.f32 %v409_v61, %v1414_v28  ;;  %835 = vmatmul.f32.gmra.mxu3 %v650_v60  ;;  %965 = vmatmul.f32.gmra.mxu1 %v650_v60  ;;  %v474_v63 = vpop.f32.mrf.mxu3 }
 0x153   :  { %v542_v0 = vpop.f32.mrf.mxu0 }
 0x154   :  { %v475_v1 = vadd.f32 %v474_v63, %v410_v62  ;;  %v543_v2 = vadd.f32 %v542_v0, %v1411_v24  ;;  %v607_v3 = vpop.f32.mrf.mxu1 }
 0x156   :  { %v649_v4 = vmax.f32 %v475_v1, 0.0  ;;  %v608_v5 = vadd.f32 %v607_v3, %v543_v2 }
 0x158   :  { %v652_v6 = vmax.f32 %v608_v5, 0.0  ;;  %770 = vmatmul.f32.gmra.mxu2 %v649_v4  ;;  %900 = vmatmul.f32.gmra.mxu0 %v649_v4 }
 0x159   :  { %v412_v7 = vpop.f32.mrf.mxu2 }
 0x15a   :  { %v413_v8 = vadd.f32 %v412_v7, %v1414_v28  ;;  %838 = vmatmul.f32.gmra.mxu3 %v652_v6  ;;  %968 = vmatmul.f32.gmra.mxu1 %v652_v6  ;;  %v477_v9 = vpop.f32.mrf.mxu3 }
 0x15b   :  { %v545_v10 = vpop.f32.mrf.mxu0 }
 0x15c   :  { %v478_v11 = vadd.f32 %v477_v9, %v413_v8  ;;  %v546_v12 = vadd.f32 %v545_v10, %v1411_v24  ;;  %v610_v13 = vpop.f32.mrf.mxu1 }
 0x15e   :  { %v651_v14 = vmax.f32 %v478_v11, 0.0  ;;  %v611_v15 = vadd.f32 %v610_v13, %v546_v12 }
 0x160   :  { %v654_v16 = vmax.f32 %v611_v15, 0.0  ;;  %773 = vmatmul.f32.gmra.mxu2 %v651_v14  ;;  %903 = vmatmul.f32.gmra.mxu0 %v651_v14 }
 0x161   :  { %v415_v17 = vpop.f32.mrf.mxu2 }
 0x162   :  { %v416_v18 = vadd.f32 %v415_v17, %v1414_v28  ;;  %841 = vmatmul.f32.gmra.mxu3 %v654_v16  ;;  %971 = vmatmul.f32.gmra.mxu1 %v654_v16  ;;  %v480_v19 = vpop.f32.mrf.mxu3 }
 0x163   :  { %v548_v20 = vpop.f32.mrf.mxu0 }
 0x164   :  { %v481_v21 = vadd.f32 %v480_v19, %v416_v18  ;;  %v549_v22 = vadd.f32 %v548_v20, %v1411_v24  ;;  %v613_v23 = vpop.f32.mrf.mxu1 }
 0x166   :  { %v653_v25 = vmax.f32 %v481_v21, 0.0  ;;  %v614_v26 = vadd.f32 %v613_v23, %v549_v22 }
 0x168   :  { %v656_v49 = vmax.f32 %v614_v26, 0.0  ;;  %776 = vmatmul.f32.gmra.mxu2 %v653_v25  ;;  %906 = vmatmul.f32.gmra.mxu0 %v653_v25 }
 0x169   :  { %v418_v27 = vpop.f32.mrf.mxu2 }
 0x16a   :  { %v419_v50 = vadd.f32 %v418_v27, %v1414_v28  ;;  %844 = vmatmul.f32.gmra.mxu3 %v656_v49  ;;  %974 = vmatmul.f32.gmra.mxu1 %v656_v49  ;;  %v483_v29 = vpop.f32.mrf.mxu3 }
 0x16b   :  { %v551_v30 = vpop.f32.mrf.mxu0 }
 0x16c   :  { %v484_v31 = vadd.f32 %v483_v29, %v419_v50  ;;  %v552_v32 = vadd.f32 %v551_v30, %v1411_v24  ;;  %v616_v33 = vpop.f32.mrf.mxu1 }
 0x16e   :  { %v655_v34 = vmax.f32 %v484_v31, 0.0  ;;  %v617_v35 = vadd.f32 %v616_v33, %v552_v32 }
 0x170   :  { %v658_v36 = vmax.f32 %v617_v35, 0.0  ;;  %779 = vmatmul.f32.gmra.mxu2 %v655_v34  ;;  %909 = vmatmul.f32.gmra.mxu0 %v655_v34 }
 0x171   :  { %v421_v37 = vpop.f32.mrf.mxu2 }
 0x172   :  { %v422_v38 = vadd.f32 %v421_v37, %v1414_v28  ;;  %847 = vmatmul.f32.gmra.mxu3 %v658_v36  ;;  %977 = vmatmul.f32.gmra.mxu1 %v658_v36  ;;  %v486_v39 = vpop.f32.mrf.mxu3 }
 0x173   :  { %v554_v40 = vpop.f32.mrf.mxu0 }
 0x174   :  { %v487_v41 = vadd.f32 %v486_v39, %v422_v38  ;;  %v555_v42 = vadd.f32 %v554_v40, %v1411_v24  ;;  %v619_v43 = vpop.f32.mrf.mxu1 }
 0x176   :  { %v657_v44 = vmax.f32 %v487_v41, 0.0  ;;  %v620_v45 = vadd.f32 %v619_v43, %v555_v42 }
 0x178   :  { %v660_v46 = vmax.f32 %v620_v45, 0.0  ;;  %782 = vmatmul.f32.gmra.mxu2 %v657_v44  ;;  %912 = vmatmul.f32.gmra.mxu0 %v657_v44 }
 0x179   :  { %v424_v47 = vpop.f32.mrf.mxu2 }
 0x17a   :  { %v425_v48 = vadd.f32 %v424_v47, %v1414_v28  ;;  %850 = vmatmul.f32.gmra.mxu3 %v660_v46  ;;  %980 = vmatmul.f32.gmra.mxu1 %v660_v46  ;;  %v489_v51 = vpop.f32.mrf.mxu3 }
 0x17b   :  { %v557_v52 = vpop.f32.mrf.mxu0 }
 0x17c   :  { %v490_v53 = vadd.f32 %v489_v51, %v425_v48  ;;  %v558_v54 = vadd.f32 %v557_v52, %v1411_v24  ;;  %v622_v55 = vpop.f32.mrf.mxu1 }
 0x17e   :  { %v659_v56 = vmax.f32 %v490_v53, 0.0  ;;  %v623_v57 = vadd.f32 %v622_v55, %v558_v54 }
 0x180   :  { %v662_v58 = vmax.f32 %v623_v57, 0.0  ;;  %785 = vmatmul.f32.gmra.mxu2 %v659_v56  ;;  %915 = vmatmul.f32.gmra.mxu0 %v659_v56 }
 0x181   :  { %v427_v59 = vpop.f32.mrf.mxu2 }
 0x182   :  { %v428_v60 = vadd.f32 %v427_v59, %v1414_v28  ;;  %853 = vmatmul.f32.gmra.mxu3 %v662_v58  ;;  %983 = vmatmul.f32.gmra.mxu1 %v662_v58  ;;  %v492_v61 = vpop.f32.mrf.mxu3 }
 0x183   :  { %v560_v62 = vpop.f32.mrf.mxu0 }
 0x184   :  { %v493_v63 = vadd.f32 %v492_v61, %v428_v60  ;;  %v561_v0 = vadd.f32 %v560_v62, %v1411_v24  ;;  %v625_v1 = vpop.f32.mrf.mxu1 }
 0x186   :  { %v661_v2 = vmax.f32 %v493_v63, 0.0  ;;  %v626_v3 = vadd.f32 %v625_v1, %v561_v0  ;;  %v739_v63 = vld [vmem:[%s1564_s6] sm:$0x3] }
 0x188   :  { %v664_v4 = vmax.f32 %v626_v3, 0.0  ;;  %788 = vmatmul.f32.gmra.mxu2 %v661_v2  ;;  %918 = vmatmul.f32.gmra.mxu0 %v661_v2 }
 0x189   :  { %v430_v5 = vpop.f32.mrf.mxu2 }
 0x18a   :  { %v431_v6 = vadd.f32 %v430_v5, %v1414_v28  ;;  %856 = vmatmul.f32.gmra.mxu3 %v664_v4  ;;  %986 = vmatmul.f32.gmra.mxu1 %v664_v4  ;;  %v495_v7 = vpop.f32.mrf.mxu3  ;;  %v1455_v4 = vperm.slane %v739_v63, 0 }
 0x18b   :  { %v563_v8 = vpop.f32.mrf.mxu0 }
 0x18c   :  { %v496_v9 = vadd.f32 %v495_v7, %v431_v6  ;;  %v564_v10 = vadd.f32 %v563_v8, %v1411_v24  ;;  %v628_v11 = vpop.f32.mrf.mxu1 }
 0x18e   :  { %v663_v12 = vmax.f32 %v496_v9, 0.0  ;;  %v629_v13 = vadd.f32 %v628_v11, %v564_v10 }
 0x190   :  { %v666_v14 = vmax.f32 %v629_v13, 0.0  ;;  %791 = vmatmul.f32.gmra.mxu2 %v663_v12  ;;  %921 = vmatmul.f32.gmra.mxu0 %v663_v12 }
 0x191   :  { %v433_v15 = vpop.f32.mrf.mxu2 }
 0x192   :  { %v434_v16 = vadd.f32 %v433_v15, %v1414_v28  ;;  %859 = vmatmul.f32.gmra.mxu3 %v666_v14  ;;  %989 = vmatmul.f32.gmra.mxu1 %v666_v14  ;;  %v498_v17 = vpop.f32.mrf.mxu3 }
 0x193   :  { %v566_v18 = vpop.f32.mrf.mxu0 }
 0x194   :  { %v499_v19 = vadd.f32 %v498_v17, %v434_v16  ;;  %v567_v20 = vadd.f32 %v566_v18, %v1411_v24  ;;  %v631_v21 = vpop.f32.mrf.mxu1 }
 0x196   :  { %v665_v22 = vmax.f32 %v499_v19, 0.0  ;;  %v632_v23 = vadd.f32 %v631_v21, %v567_v20 }
 0x198   :  { %v668_v25 = vmax.f32 %v632_v23, 0.0  ;;  %794 = vmatmul.f32.gmra.mxu2 %v665_v22  ;;  %924 = vmatmul.f32.gmra.mxu0 %v665_v22 }
 0x199   :  { %v436_v26 = vpop.f32.mrf.mxu2 }
 0x19a   :  { %v437_v49 = vadd.f32 %v436_v26, %v1414_v28  ;;  %862 = vmatmul.f32.gmra.mxu3 %v668_v25  ;;  %992 = vmatmul.f32.gmra.mxu1 %v668_v25  ;;  %v501_v27 = vpop.f32.mrf.mxu3 }
 0x19b   :  { %v569_v50 = vpop.f32.mrf.mxu0 }
 0x19c   :  { %v502_v29 = vadd.f32 %v501_v27, %v437_v49  ;;  %v570_v30 = vadd.f32 %v569_v50, %v1411_v24  ;;  %v634_v31 = vpop.f32.mrf.mxu1 }
 0x19e   :  { %v667_v32 = vmax.f32 %v502_v29, 0.0  ;;  %v635_v33 = vadd.f32 %v634_v31, %v570_v30 }
 0x1a0   :  { %v670_v34 = vmax.f32 %v635_v33, 0.0  ;;  %797 = vmatmul.f32.gmra.mxu2 %v667_v32  ;;  %927 = vmatmul.f32.gmra.mxu0 %v667_v32 }
 0x1a1   :  { %v439_v35 = vpop.f32.mrf.mxu2 }
 0x1a2   :  { %v440_v36 = vadd.f32 %v439_v35, %v1414_v28  ;;  %865 = vmatmul.f32.gmra.mxu3 %v670_v34  ;;  %995 = vmatmul.f32.gmra.mxu1 %v670_v34  ;;  %v504_v37 = vpop.f32.mrf.mxu3 }
 0x1a3   :  { %v572_v38 = vpop.f32.mrf.mxu0 }
 0x1a4   :  { %v505_v39 = vadd.f32 %v504_v37, %v440_v36  ;;  %v573_v40 = vadd.f32 %v572_v38, %v1411_v24  ;;  %v637_v41 = vpop.f32.mrf.mxu1 }
 0x1a6   :  { %v669_v42 = vmax.f32 %v505_v39, 0.0  ;;  %v638_v43 = vadd.f32 %v637_v41, %v573_v40 }
 0x1a8   :  { %v672_v44 = vmax.f32 %v638_v43, 0.0  ;;  %800 = vmatmul.f32.gmra.mxu2 %v669_v42  ;;  %930 = vmatmul.f32.gmra.mxu0 %v669_v42 }
 0x1a9   :  { %v442_v45 = vpop.f32.mrf.mxu2 }
 0x1aa   :  { %v443_v46 = vadd.f32 %v442_v45, %v1414_v28  ;;  %868 = vmatmul.f32.gmra.mxu3 %v672_v44  ;;  %998 = vmatmul.f32.gmra.mxu1 %v672_v44  ;;  %v507_v47 = vpop.f32.mrf.mxu3 }
 0x1ab   :  { %v575_v48 = vpop.f32.mrf.mxu0 }
 0x1ac   :  { %v508_v51 = vadd.f32 %v507_v47, %v443_v46  ;;  %v576_v52 = vadd.f32 %v575_v48, %v1411_v24  ;;  %v640_v53 = vpop.f32.mrf.mxu1  ;;  %v1450_v24 = vperm.slane %v739_v63, 1 }
 0x1ae   :  { %v671_v54 = vmax.f32 %v508_v51, 0.0  ;;  %v641_v55 = vadd.f32 %v640_v53, %v576_v52 }
 0x1b0   :  { %v674_v56 = vmax.f32 %v641_v55, 0.0  ;;  %803 = vmatmul.f32.gmra.mxu2 %v671_v54  ;;  %933 = vmatmul.f32.gmra.mxu0 %v671_v54 }
 0x1b1   :  { %v445_v57 = vpop.f32.mrf.mxu2 }
 0x1b2   :  { %v446_v58 = vadd.f32 %v445_v57, %v1414_v28  ;;  %871 = vmatmul.f32.gmra.mxu3 %v674_v56  ;;  %1001 = vmatmul.f32.gmra.mxu1 %v674_v56  ;;  %v510_v59 = vpop.f32.mrf.mxu3 }
 0x1b4   :  { %v511_v60 = vadd.f32 %v510_v59, %v446_v58 }
 0x1b6   :  { %v673_v61 = vmax.f32 %v511_v60, 0.0 }
 0x1b7   :  { %v957_v62 = vpop.f32.mrf.mxu1 }
 0x1b8   :  { %806 = vmatmul.f32.gmra.mxu2 %v673_v61  ;;  %936 = vmatmul.f32.gmra.mxu0 %v673_v61 }
 0x1bd   :  { %v827_v0 = vpop.f32.mrf.mxu3  ;;  %v892_v1 = vpop.f32.mrf.mxu0 }
 0x1be   :  { %v893_v2 = vadd.f32 %v892_v1, %v1450_v24 }
 0x1bf   :  { %v960_v3 = vpop.f32.mrf.mxu1 }
 0x1c0   :  { %v1453_v28 = vadd.f32 %v957_v62, %v893_v2 }
 0x1c3   :  { %v762_v5 = vpop.f32.mrf.mxu2 }
 0x1c4   :  { %v763_v6 = vadd.f32 %v762_v5, %v1455_v4 }
 0x1c5   :  { %v830_v7 = vpop.f32.mrf.mxu3  ;;  %v895_v8 = vpop.f32.mrf.mxu0 }
 0x1c6   :  { %v1458_v9 = vadd.f32 %v827_v0, %v763_v6  ;;  %v896_v10 = vadd.f32 %v895_v8, %v1450_v24 }
 0x1c7   :  { %v963_v11 = vpop.f32.mrf.mxu1 }
 0x1c8   :  { %v1461_v12 = vadd.f32 %v960_v3, %v896_v10 }
 0x1cb   :  { %v765_v13 = vpop.f32.mrf.mxu2 }
 0x1cc   :  { %v766_v14 = vadd.f32 %v765_v13, %v1455_v4 }
 0x1cd   :  { %v833_v15 = vpop.f32.mrf.mxu3  ;;  %v898_v16 = vpop.f32.mrf.mxu0 }
 0x1ce   :  { %v1464_v17 = vadd.f32 %v830_v7, %v766_v14  ;;  %v899_v18 = vadd.f32 %v898_v16, %v1450_v24 }
 0x1cf   :  { %v966_v19 = vpop.f32.mrf.mxu1 }
 0x1d0   :  { %v1467_v20 = vadd.f32 %v963_v11, %v899_v18 }
 0x1d3   :  { %v768_v21 = vpop.f32.mrf.mxu2 }
 0x1d4   :  { %v769_v22 = vadd.f32 %v768_v21, %v1455_v4 }
 0x1d5   :  { %v836_v23 = vpop.f32.mrf.mxu3  ;;  %v901_v25 = vpop.f32.mrf.mxu0 }
 0x1d6   :  { %v1470_v26 = vadd.f32 %v833_v15, %v769_v22  ;;  %v902_v49 = vadd.f32 %v901_v25, %v1450_v24 }
 0x1d7   :  { %v969_v27 = vpop.f32.mrf.mxu1 }
 0x1d8   :  { %v1473_v50 = vadd.f32 %v966_v19, %v902_v49 }
 0x1db   :  { %v771_v29 = vpop.f32.mrf.mxu2 }
 0x1dc   :  { %v772_v30 = vadd.f32 %v771_v29, %v1455_v4 }
 0x1dd   :  { %v839_v31 = vpop.f32.mrf.mxu3  ;;  %v904_v32 = vpop.f32.mrf.mxu0 }
 0x1de   :  { %v1476_v33 = vadd.f32 %v836_v23, %v772_v30  ;;  %v905_v34 = vadd.f32 %v904_v32, %v1450_v24 }
 0x1df   :  { %v972_v35 = vpop.f32.mrf.mxu1 }
 0x1e0   :  { %v1479_v36 = vadd.f32 %v969_v27, %v905_v34 }
 0x1e3   :  { %v774_v37 = vpop.f32.mrf.mxu2 }
 0x1e4   :  { %v775_v38 = vadd.f32 %v774_v37, %v1455_v4 }
 0x1e5   :  { %v842_v39 = vpop.f32.mrf.mxu3  ;;  %v907_v40 = vpop.f32.mrf.mxu0 }
 0x1e6   :  { %v1482_v41 = vadd.f32 %v839_v31, %v775_v38  ;;  %v908_v42 = vadd.f32 %v907_v40, %v1450_v24 }
 0x1e7   :  { %v975_v43 = vpop.f32.mrf.mxu1 }
 0x1e8   :  { %v1485_v44 = vadd.f32 %v972_v35, %v908_v42 }
 0x1eb   :  { %v777_v45 = vpop.f32.mrf.mxu2 }
 0x1ec   :  { %v778_v46 = vadd.f32 %v777_v45, %v1455_v4 }
 0x1ed   :  { %v845_v47 = vpop.f32.mrf.mxu3  ;;  %v910_v48 = vpop.f32.mrf.mxu0 }
 0x1ee   :  { %v1488_v51 = vadd.f32 %v842_v39, %v778_v46  ;;  %v911_v52 = vadd.f32 %v910_v48, %v1450_v24 }
 0x1ef   :  { %v978_v53 = vpop.f32.mrf.mxu1 }
 0x1f0   :  { %v1491_v54 = vadd.f32 %v975_v43, %v911_v52 }
 0x1f3   :  { %v780_v55 = vpop.f32.mrf.mxu2 }
 0x1f4   :  { %v781_v56 = vadd.f32 %v780_v55, %v1455_v4 }
 0x1f5   :  { %v848_v57 = vpop.f32.mrf.mxu3  ;;  %v913_v58 = vpop.f32.mrf.mxu0 }
 0x1f6   :  { %v1494_v59 = vadd.f32 %v845_v47, %v781_v56  ;;  %v914_v60 = vadd.f32 %v913_v58, %v1450_v24 }
 0x1f7   :  { %v981_v61 = vpop.f32.mrf.mxu1 }
 0x1f8   :  { %v1497_v62 = vadd.f32 %v978_v53, %v914_v60 }
 0x1fb   :  { %v783_v63 = vpop.f32.mrf.mxu2 }
 0x1fc   :  { %v784_v0 = vadd.f32 %v783_v63, %v1455_v4 }
 0x1fd   :  { %v851_v1 = vpop.f32.mrf.mxu3  ;;  %v916_v2 = vpop.f32.mrf.mxu0 }
 0x1fe   :  { %v1500_v3 = vadd.f32 %v848_v57, %v784_v0  ;;  %v917_v5 = vadd.f32 %v916_v2, %v1450_v24 }
 0x1ff   :  { %v984_v6 = vpop.f32.mrf.mxu1 }
 0x200   :  { %v1503_v7 = vadd.f32 %v981_v61, %v917_v5 }
 0x203   :  { %v786_v8 = vpop.f32.mrf.mxu2 }
 0x204   :  { %v787_v10 = vadd.f32 %v786_v8, %v1455_v4 }
 0x205   :  { %v854_v11 = vpop.f32.mrf.mxu3  ;;  %v919_v13 = vpop.f32.mrf.mxu0 }
 0x206   :  { %v1506_v14 = vadd.f32 %v851_v1, %v787_v10  ;;  %v920_v15 = vadd.f32 %v919_v13, %v1450_v24 }
 0x207   :  { %v987_v16 = vpop.f32.mrf.mxu1 }
 0x208   :  { %v1509_v18 = vadd.f32 %v984_v6, %v920_v15 }
 0x20b   :  { %v789_v19 = vpop.f32.mrf.mxu2 }
 0x20c   :  { %v790_v21 = vadd.f32 %v789_v19, %v1455_v4 }
 0x20d   :  { %v1512_v22 = vpop.f32.mrf.mxu3  ;;  %v922_v23 = vpop.f32.mrf.mxu0 }
 0x20e   :  { %v1514_v25 = vadd.f32 %v854_v11, %v790_v21 }
 0x20f   :  { %v990_v49 = vpop.f32.mrf.mxu1 }
 0x213   :  { %v792_v27 = vpop.f32.mrf.mxu2 }
 0x215   :  { %v860_v29 = vpop.f32.mrf.mxu3  ;;  %v925_v30 = vpop.f32.mrf.mxu0 }
 0x216   :  { %v926_v15 = vadd.f32 %v925_v30, %v1450_v24 }
 0x217   :  { %v993_v31 = vpop.f32.mrf.mxu1 }
 0x21b   :  { %v795_v32 = vpop.f32.mrf.mxu2 }
 0x21d   :  { %v928_v34 = vpop.f32.mrf.mxu0  ;;  %v863_v35 = vpop.f32.mrf.mxu3 }
 0x21e   :  { %v929_v2 = vadd.f32 %v928_v34, %v1450_v24  ;;  %v923_v34 = vadd.f32 %v922_v23, %v1450_v24 }
 0x21f   :  { %v996_v37 = vpop.f32.mrf.mxu1 }
 0x220   :  { %v994_v19 = vadd.f32 %v993_v31, %v929_v2  ;;  %v793_v31 = vadd.f32 %v792_v27, %v1455_v4  ;;  %v1021_v27 = vmax.f32 %v1506_v14, 0.0  ;;  %v1012_v14 = vmax.f32 %v1473_v50, 0.0  ;;  %v1037_v50 = vld [vmem:[%s1565_s7] sm:$0x3]  ;;  %s1306_s7 = smov [#allocation11]  }
 0x221   :  { %s1110_s15 = sshll.u32 %s1306_s7, 4  ;;  %s1111_s15 = int_to_ptr.vmem [resolvable:$true] %s1110_s15 }
 0x223   :  { %v798_v38 = vpop.f32.mrf.mxu2 }
 0x225   :  { %v931_v39 = vpop.f32.mrf.mxu0  ;;  %v866_v40 = vpop.f32.mrf.mxu3 }
 0x226   :  { %v932_v57 = vadd.f32 %v931_v39, %v1450_v24  ;;  %v799_v39 = vadd.f32 %v798_v38, %v1455_v4 }
 0x227   :  { %v999_v43 = vpop.f32.mrf.mxu1 }
 0x228   :  { %v997_v5 = vadd.f32 %v996_v37, %v932_v57  ;;  %v991_v37 = vadd.f32 %v990_v49, %v926_v15  ;;  %v1024_v49 = vmax.f32 %v1509_v18, 0.0  ;;  %v1019_v18 = vmax.f32 %v1500_v3, 0.0 }
 0x229   :  { %v1010_v3 = vmax.f32 %v1467_v20, 0.0  ;;  %v1007_v20 = vmax.f32 %v1464_v17, 0.0 }
 0x22a   :  { %v1032_v21 = vmax.f32 %v997_v5, 0.0  ;;  %v1028_v30 = vmax.f32 %v991_v37, 0.0 }
 0x22b   :  { %v801_v42 = vpop.f32.mrf.mxu2 }
 0x22c   :  { %v802_v10 = vadd.f32 %v801_v42, %v1455_v4  ;;  %v796_v42 = vadd.f32 %v795_v32, %v1455_v4 }
 0x22d   :  { %v934_v45 = vpop.f32.mrf.mxu0  ;;  %v869_v46 = vpop.f32.mrf.mxu3 }
 0x22e   :  { %v935_v52 = vadd.f32 %v934_v45, %v1450_v24 }
 0x22f   :  { %v1002_v55 = vpop.f32.mrf.mxu1 }
 0x230   :  { %v1000_v58 = vadd.f32 %v999_v43, %v935_v52  ;;  %v867_v43 = vadd.f32 %v866_v40, %v802_v10  ;;  %v988_v52 = vadd.f32 %v987_v16, %v923_v34  ;;  %v1022_v16 = vmax.f32 %v1503_v7, 0.0 }
 0x231   :  { %v1017_v7 = vmax.f32 %v1494_v59, 0.0  ;;  %v1008_v59 = vmax.f32 %v1461_v12, 0.0  ;;  %v1041_v12 = vperm.slane %v1037_v50, 0 }
 0x232   :  { %v1034_v6 = vmax.f32 %v1000_v58, 0.0  ;;  %v1026_v40 = vmax.f32 %v988_v52, 0.0 }
 0x233   :  { %v804_v47 = vpop.f32.mrf.mxu2 }
 0x234   :  { %v805_v63 = vadd.f32 %v804_v47, %v1455_v4  ;;  %v1030_v47 = vmax.f32 %v994_v19, 0.0 }
 0x235   :  { %v937_v48 = vpop.f32.mrf.mxu0  ;;  %v872_v1 = vpop.f32.mrf.mxu3 }
 0x236   :  { %v938_v53 = vadd.f32 %v937_v48, %v1450_v24  ;;  %v870_v11 = vadd.f32 %v869_v46, %v805_v63  ;;  %v864_v46 = vadd.f32 %v863_v35, %v799_v39  ;;  %v1031_v48 = vmax.f32 %v867_v43, 0.0 }
 0x237   :  { %v858_v24 = vadd.f32 %v1512_v22, %v793_v31  ;;  %v1023_v35 = vmax.f32 %v1514_v25, 0.0  ;;  %v1018_v22 = vmax.f32 %v1491_v54, 0.0  ;;  %v1014_v25 = vmax.f32 %v1479_v36, 0.0 }
 0x238   :  { %v1003_v56 = vadd.f32 %v1002_v55, %v938_v53  ;;  %v1033_v45 = vmax.f32 %v870_v11, 0.0  ;;  %v861_v53 = vadd.f32 %v860_v29, %v796_v42  ;;  %v1029_v38 = vmax.f32 %v864_v46, 0.0 }
 0x239   :  { %v1025_v32 = vmax.f32 %v858_v24, 0.0  ;;  %v1016_v29 = vmax.f32 %v1485_v44, 0.0  ;;  %v1013_v54 = vmax.f32 %v1482_v41, 0.0  ;;  %v1011_v44 = vmax.f32 %v1476_v33, 0.0 }
 0x23a   :  { %v1036_v60 = vmax.f32 %v1003_v56, 0.0  ;;  %v1027_v23 = vmax.f32 %v861_v53, 0.0  ;;  %v1009_v36 = vmax.f32 %v1470_v26, 0.0  ;;  %v1042_v41 = vperm.slane %v1037_v50, 1 }
 0x23b   :  { %v807_v61 = vpop.f32.mrf.mxu2  ;;  %v1005_v33 = vmax.f32 %v1458_v9, 0.0 }
 0x23c   :  { %v808_v0 = vadd.f32 %v807_v61, %v1455_v4  ;;  %1065 = vmatpush.xpose.msrb.mxu3 %v1036_v60  ;;  %v1020_v4 = vmax.f32 %v1497_v62, 0.0  ;;  %v1015_v62 = vmax.f32 %v1488_v51, 0.0  ;;  %v1006_v51 = vmax.f32 %v1453_v28, 0.0 }
 0x23d   :  { %v1039_v28 = vstv %s1566_s8 }
 0x23e   :  { %v873_v8 = vadd.f32 %v872_v1, %v808_v0 }
 0x240   :  { %v1035_v13 = vmax.f32 %v873_v8, 0.0  ;;  %1066 = vmatpush.xpose.msrb.mxu3 %v1034_v6 }
 0x242   :  { %1045 = vmatpush.xpose.msrb.mxu2 %v1035_v13 }
 0x244   :  { %1067 = vmatpush.xpose.msrb.mxu3 %v1032_v21 }
 0x246   :  { %1046 = vmatpush.xpose.msrb.mxu2 %v1033_v45 }
 0x248   :  { %1068 = vmatpush.xpose.msrb.mxu3 %v1030_v47 }
 0x24a   :  { %1047 = vmatpush.xpose.msrb.mxu2 %v1031_v48 }
 0x24c   :  { %1069 = vmatpush.xpose.msrb.mxu3 %v1028_v30 }
 0x24e   :  { %1048 = vmatpush.xpose.msrb.mxu2 %v1029_v38 }
 0x250   :  { %1070 = vmatpush.xpose.msrb.mxu3 %v1026_v40 }
 0x252   :  { %1049 = vmatpush.xpose.msrb.mxu2 %v1027_v23 }
 0x254   :  { %1071 = vmatpush.xpose.msrb.mxu3 %v1024_v49 }
 0x256   :  { %1050 = vmatpush.xpose.msrb.mxu2 %v1025_v32 }
 0x258   :  { %1072 = vmatpush.xpose.msrb.mxu3 %v1022_v16 }
 0x25a   :  { %1051 = vmatpush.xpose.msrb.mxu2 %v1023_v35 }
 0x25c   :  { %1073 = vmatpush.xpose.msrb.mxu3 %v1020_v4 }
 0x25e   :  { %1052 = vmatpush.xpose.msrb.mxu2 %v1021_v27 }
 0x260   :  { %1074 = vmatpush.xpose.msrb.mxu3 %v1018_v22 }
 0x262   :  { %1053 = vmatpush.xpose.msrb.mxu2 %v1019_v18 }
 0x264   :  { %1075 = vmatpush.xpose.msrb.mxu3 %v1016_v29 }
 0x266   :  { %1054 = vmatpush.xpose.msrb.mxu2 %v1017_v7 }
 0x268   :  { %1076 = vmatpush.xpose.msrb.mxu3 %v1014_v25 }
 0x26a   :  { %1055 = vmatpush.xpose.msrb.mxu2 %v1015_v62 }
 0x26c   :  { %1077 = vmatpush.xpose.msrb.mxu3 %v1012_v14 }
 0x26e   :  { %1056 = vmatpush.xpose.msrb.mxu2 %v1013_v54 }
 0x270   :  { %1078 = vmatpush.xpose.msrb.mxu3 %v1010_v3 }
 0x272   :  { %1057 = vmatpush.xpose.msrb.mxu2 %v1011_v44 }
 0x274   :  { %1079 = vmatpush.xpose.msrb.mxu3 %v1008_v59 }
 0x276   :  { %1058 = vmatpush.xpose.msrb.mxu2 %v1009_v36 }
 0x278   :  { %1080 = vmatpush.xpose.msrb.mxu3 %v1006_v51 }
 0x27a   :  { %1059 = vmatpush.xpose.msrb.mxu2 %v1007_v20 }
 0x27b   :  { %1081 = vmatmul.f32.vlgmr.msrb.gmra.mxu3 %v1042_v41 }
 0x27e   :  { %1060 = vmatpush.xpose.msrb.mxu2 %v1005_v33 }
 0x281   :  { %1061 = vmatmul.f32.vlgmr.msrb.gmra.mxu2 %v1041_v12 }
 0x2fe   :  { %v1082_v55 = vpop.f32.mrf.mxu3 }
 0x304   :  { %v1062_v26 = vpop.f32.mrf.mxu2 }
 0x305   :  { %v1063_v56 = vadd.f32 %v1062_v26, %v1039_v28 }
 0x307   :  { %v1083_v57 = vadd.f32 %v1082_v55, %v1063_v56 }
 0x309   :  { %v1124_v58 = vmul.f32 -1.442695, %v1083_v57 }
 0x30b   :  { %1166 = vpow2.f32 %v1124_v58 }
 0x311   :  { %v1167_v60 = vpop.eup %1166 }
 0x312   :  { %v1088_v17 = vadd.f32 1.0, %v1167_v60 }
 0x314   :  { %1168 = vrcp.f32 %v1088_v17  ;;  %v1100_v9 = vand.u32 2147483648, %v1088_v17  ;;  %v1098_v2 = vand.u32 2147483647, %v1088_v17  ;;  %vm1094_vm1 = vweird.f32 %v1088_v17 }
 0x316   :  { %v1101_v6 = vor.u32 1.1754944e-38, %v1100_v9  ;;  %vm1099_vm3 = vcmp.eq.f32.partialorder %v1098_v2, 8.507059e+37 }
 0x31a   :  { %v1169_v61 = vpop.eup %1168 }
 0x31b   :  { %v1090_v63 = vmul.f32 %v1169_v61, %v1088_v17  ;;  %vm1095_vm0 = vweird.f32 %v1169_v61 }
 0x31c   :  { %vm1096_vm2 = vmor %vm1094_vm1, %vm1095_vm0 }
 0x31d   :  { %v1091_v0 = vsub.f32 1.0, %v1090_v63 }
 0x31f   :  { %v1092_v1 = vmul.f32 %v1169_v61, %v1091_v0 }
 0x321   :  { %v1093_v5 = vadd.f32 %v1169_v61, %v1092_v1 }
 0x323   :  { %v1097_v8 = vsel %vm1096_vm2, %v1169_v61, %v1093_v5 }
 0x324   :  { %v1102_v10 = vsel %vm1099_vm3, %v1101_v6, %v1097_v8 }
 0x325   :  { %1104 = vst [vmem:[#allocation11] sm:$0x1] %v1102_v10 }
 0x326   :  { %1115 = dma.vmem_to_hbm [thread:$0]  %s1111_s15, 16, %s1113_s17, [#allocation5]  }
 0x327   :  { %1296 = dma.done.wait [#allocation5], 16  }
 0x328   :  { %1297 = vsyncadd [#allocation5], 4294967280 }
 0x329   :  { %1120 = vsyncpa [#allocation4], 1 }
 0x32a   :  { %1121 = vsyncpa [#allocation7], 1 }
 0x32b   :  { %1122 = vsyncpa [#allocation10], 1 }
 0x32c   :  { %1123 = vsyncpa [#allocation5], 1 }

</bundles_post_ra>
